<compile_context>
chip_gen: v5e
topology: v5e:2x2
jax: 0.10.0
libtpu: 0.0.40
codegen_flags: <defaults>
</compile_context>

<pallas_src>
import functools
import math

import jax
import jax.numpy as jnp
import numpy as np
from jax.experimental import pallas as pl
from jax.experimental.pallas import tpu as pltpu


_MIN_GRID_STEPS = 8  # >=2 keeps both v7x TensorCores busy; ~8 gives pipeline depth.


def _cdiv(a, b):
    return -(-a // b)


@functools.lru_cache(maxsize=None)
def _vmem_budget():
    """Returns (vmem_limit_bytes, block_bytes_target), generation aware."""
    cap = None
    try:
        cap = getattr(pltpu.get_tpu_info(), "vmem_capacity_bytes", None)
    except Exception:
        cap = None
    if cap is not None and cap > 80 * 2**20:
        # v5e / v6e class: 128 MiB VMEM per TensorCore.
        return 48 * 2**20, 4 * 2**20
    # v7x class (64 MiB VMEM) or unknown: stay conservative.
    return 36 * 2**20, 2 * 2**20


def _simplify_permutation(shape, dims):
    """Merge runs of input axes that stay adjacent & in-order in the output.

    Returns (reduced_shape, reduced_perm).  Example:
      shape (N, C, H, W), dims (0, 2, 3, 1) -> ((N, C, H*W), (0, 2, 1))
    """
    groups = []  # groups of consecutive input axes, in OUTPUT order
    for d in dims:
        if groups and d == groups[-1][-1] + 1:
            groups[-1].append(d)
        else:
            groups.append([d])
    order = sorted(range(len(groups)), key=lambda g: groups[g][0])
    red_shape = tuple(
        int(np.prod([shape[a] for a in groups[g]], dtype=np.int64)) for g in order
    )
    pos = {g: i for i, g in enumerate(order)}
    red_perm = tuple(pos[g] for g in range(len(groups)))  # output order
    return red_shape, red_perm


def _relayout_kernel(perm, x_ref, o_ref):
    """Transpose the VMEM tile by `perm` and store it into o_ref's layout."""
    y = x_ref[...]
    if perm != tuple(range(len(perm))):
        y = jnp.transpose(y, perm)
    # TODO(synk): fuse the transpose + flatten into a single pltpu.einshape
    # relayout (e.g. "bac->b(ca)") once grouped equations are validated on all
    # target generations; transpose+reshape is kept because it lowers cleanly.
    o_ref[...] = y.reshape(o_ref.shape)


def _transpose_2d(xr, *, block_bytes, vmem_limit):
    """Tiled 2-D transpose: (M, N) -> (N, M) with swapped in/out index maps."""
    M, N = xr.shape
    itemsize = jnp.dtype(xr.dtype).itemsize
    target_elems = max(8 * 128, block_bytes // itemsize)
    t = int(math.isqrt(target_elems))
    t = max(128, (t // 128) * 128)
    # Each tile dim must be a multiple of 128 (legal for both sublane/lane of
    # the in and out specs) or the full array extent.
    tm = M if M <= t else t
    tn = N if N <= t else t
    grid = (_cdiv(M, tm), _cdiv(N, tn))

    kernel = functools.partial(_relayout_kernel, (1, 0))
    return pl.pallas_call(
        kernel,
        out_shape=jax.ShapeDtypeStruct((N, M), xr.dtype),
        grid=grid,
        in_specs=[pl.BlockSpec((tm, tn), lambda i, j: (i, j))],
        out_specs=pl.BlockSpec((tn, tm), lambda i, j: (j, i)),
        compiler_params=pltpu.CompilerParams(
            dimension_semantics=("parallel", "parallel"),
            vmem_limit_bytes=vmem_limit,
        ),
        cost_estimate=pl.CostEstimate(
            flops=0, transcendentals=0,
            bytes_accessed=2 * int(xr.size) * itemsize),
    )(xr)


def _permute_batched(xr, red_perm, *, block_bytes, vmem_limit):
    """red_perm[0]==0, rank>=3: grid over the leading axis, lane-dense output."""
    shape = xr.shape
    rank = len(shape)
    n0 = shape[0]
    itemsize = jnp.dtype(xr.dtype).itemsize

    P = int(np.prod(shape[1:], dtype=np.int64))
    row_bytes = P * itemsize

    p1 = red_perm[1]          # input axis that becomes the 1st inner output axis
    s_p1 = shape[p1]
    rest = P // s_p1          # product of the remaining inner axes

    if row_bytes <= block_bytes:
        c = s_p1              # no inner tiling needed
        b0 = max(1, min(n0, block_bytes // row_bytes, _cdiv(n0, _MIN_GRID_STEPS)))
    else:
        # One batch row exceeds the block target: additionally tile the first
        # inner OUTPUT axis in 128-lane multiples (keeps blocks (8,128)-legal
        # and the flattened output chunk contiguous / lane-dense).
        b0 = 1
        c = (max(1, block_bytes // (rest * itemsize)) // 128) * 128
        if c < 128 or c >= s_p1:
            # TODO(synk): tile an additional inner axis when a single
            # (rest, 128) chunk still exceeds the per-block byte target.
            c = s_p1

    G = _cdiv(n0, b0)
    Jc = _cdiv(s_p1, c)

    in_block = list(shape)
    in_block[0] = b0
    in_block[p1] = c
    in_block = tuple(in_block)

    def in_index(i, j):
        idx = [0] * rank
        idx[0] = i
        idx[p1] = j
        return tuple(idx)

    # Lane-dense output slab: (grid, b0, P) so stores are full-width vst.
    out_block = (pl.Squeezed(), b0, c * rest)

    def out_index(i, j):
        return (i, 0, j)

    kernel = functools.partial(_relayout_kernel, red_perm)

    out = pl.pallas_call(
        kernel,
        out_shape=jax.ShapeDtypeStruct((G, b0, P), xr.dtype),
        grid=(G, Jc),
        in_specs=[pl.BlockSpec(in_block, in_index)],
        # TODO(synk): sweep pipeline_mode=pl.Buffered(3) on the input spec once
        # blocks are >= ~2 MiB (small DMA-overlap win, mainly v5e/v6e).
        out_specs=pl.BlockSpec(out_block, out_index),
        compiler_params=pltpu.CompilerParams(
            dimension_semantics=("parallel", "parallel"),
            vmem_limit_bytes=vmem_limit,
        ),
        cost_estimate=pl.CostEstimate(
            flops=0, transcendentals=0,
            bytes_accessed=2 * int(xr.size) * itemsize),
    )(xr)

    flat = out.reshape(G * b0, P)
    if G * b0 != n0:
        flat = flat[:n0]      # drop rows coming from the partial edge block
    return flat


def _permute_general(xr, red_perm, *, block_bytes, vmem_limit):
    """Fallback (rank>=3 and the leading input axis moves): tile input axis 0.

    The chunk size respects the layout rule of the output position that input
    axis 0 lands on (free / multiple of 8 / multiple of 128 / full extent).
    """
    shape = xr.shape
    rank = len(shape)
    n0 = shape[0]
    itemsize = jnp.dtype(xr.dtype).itemsize
    out_rshape = tuple(shape[d] for d in red_perm)

    p0 = red_perm.index(0)
    if p0 == rank - 1:
        req = 128
    elif p0 == rank - 2:
        req = 8
    else:
        req = 1
    slice_bytes = (int(np.prod(shape, dtype=np.int64)) // n0) * itemsize
    b0 = max(1, min(n0, block_bytes // max(1, slice_bytes)))
    if b0 < n0 and req > 1:
        b0 = (b0 // req) * req
        if b0 == 0:
            # TODO(synk): tile a second axis when this full-extent block
            # exceeds the VMEM budget.
            b0 = n0
    G = _cdiv(n0, b0)

    in_block = (b0,) + shape[1:]
    out_block = tuple(b0 if d == 0 else shape[d] for d in red_perm)

    def in_index(i):
        return (i,) + (0,) * (rank - 1)

    def out_index(i):
        return tuple(i if d == 0 else 0 for d in red_perm)

    kernel = functools.partial(_relayout_kernel, red_perm)
    # NOTE: this path relies on Mosaic's general relayout support for major-axis
    # transposes; the common NCHW<->NHWC-style permutes never reach it.
    return pl.pallas_call(
        kernel,
        out_shape=jax.ShapeDtypeStruct(out_rshape, xr.dtype),
        grid=(G,),
        in_specs=[pl.BlockSpec(in_block, in_index)],
        out_specs=pl.BlockSpec(out_block, out_index),
        compiler_params=pltpu.CompilerParams(
            dimension_semantics=("parallel",),
            vmem_limit_bytes=vmem_limit,
        ),
        cost_estimate=pl.CostEstimate(
            flops=0, transcendentals=0,
            bytes_accessed=2 * int(xr.size) * itemsize),
    )(xr)


def permute_pallas(x, dims, *, block_bytes=None):
    """Pallas equivalent of torch.Tensor.permute(*dims)."""
    dims = tuple(int(d) for d in dims)
    assert sorted(dims) == list(range(x.ndim)), "dims must be a permutation of the axes"
    out_shape = tuple(x.shape[d] for d in dims)

    if dims == tuple(range(x.ndim)):
        return x                                   # identity permutation
    if x.size == 0:
        return x.reshape(out_shape)                # nothing to move

    red_shape, red_perm = _simplify_permutation(x.shape, dims)
    if red_perm == tuple(range(len(red_perm))):
        return x                                   # collapses to identity

    vmem_limit, default_block = _vmem_budget()
    if block_bytes is None:
        block_bytes = default_block

    xr = x.reshape(red_shape)  # merges contiguous runs only: free

    if len(red_perm) == 2:
        out = _transpose_2d(xr, block_bytes=block_bytes, vmem_limit=vmem_limit)
    elif red_perm[0] == 0:
        out = _permute_batched(xr, red_perm, block_bytes=block_bytes,
                               vmem_limit=vmem_limit)
    else:
        out = _permute_general(xr, red_perm, block_bytes=block_bytes,
                               vmem_limit=vmem_limit)

    # TODO(synk): for bf16/int8 inputs with an even trailing permuted axis,
    # pack pairs/quads into uint32 (pltpu.bitcast) around the relayout to cut
    # XLU work; not implemented here.
    return out.reshape(out_shape)


if __name__ == "__main__":
    key = jax.random.PRNGKey(0)

    def check(x, dims, **kw):
        out = jax.block_until_ready(permute_pallas(x, dims, **kw))
        ref = jnp.transpose(x, dims)
        assert out.shape == ref.shape, (out.shape, ref.shape)
        assert out.dtype == ref.dtype, (out.dtype, ref.dtype)
        np.testing.assert_allclose(np.asarray(out), np.asarray(ref), rtol=0, atol=0)

    # Primary case from the module: NCHW -> NHWC, i.e. Permute(0, 2, 3, 1).
    x = jax.random.normal(key, (2, 4, 16, 16), dtype=jnp.float32)
    check(x, (0, 2, 3, 1))

    # NHWC -> NCHW style (also batch-preserving).
    check(x, (0, 3, 1, 2))

    # Permutation that moves axis 0: reduces to a 2-D transpose -> tiled path.
    check(x, (2, 3, 0, 1))

    # Inner (lane-axis) tiling path: one batch row bigger than the block target.
    x_big_row = jax.random.normal(key, (2, 4, 32, 32), dtype=jnp.float32)
    check(x_big_row, (0, 2, 3, 1), block_bytes=4096)

    # Leading axis not divisible by the chosen block: partial blocks + unpad.
    x_odd = jax.random.normal(key, (11, 4, 16, 16), dtype=jnp.float32)
    check(x_odd, (0, 2, 3, 1))

    # Tiled 2-D transpose with a ragged edge along the lane axis.
    x_ragged = jax.random.normal(key, (2, 4, 24, 24), dtype=jnp.float32)
    check(x_ragged, (2, 3, 0, 1), block_bytes=256 * 256 * 4)

    print("KERNEL_OK")
</pallas_src>

<mosaic_0001>
module attributes {stable_mosaic.version = 11 : i64} {
  func.func @_relayout_kernel(%arg0: i32, %arg1: i32, %arg2: memref<1x4x256xf32, #tpu.memory_space<vmem>>, %arg3: memref<1x1x1024xf32, #tpu.memory_space<vmem>>) attributes {dimension_semantics = [#tpu.dimension_semantics<parallel>, #tpu.dimension_semantics<parallel>], iteration_bounds = array<i64: 2, 1>, scalar_prefetch = 0 : i64, scratch_operands = 0 : i64, tpu.core_type = #tpu.core_type<tc>, window_params = [{transform_indices = @transform_0, window_bounds = array<i64: 1, 4, 256>}, {transform_indices = @transform_1, window_bounds = array<i64: 1, 1, 1024>}]} {
    %c0 = arith.constant 0 : index
    %c0_0 = arith.constant 0 : index
    %c0_1 = arith.constant 0 : index
    %0 = vector.load %arg2[%c0, %c0_0, %c0_1] : memref<1x4x256xf32, #tpu.memory_space<vmem>>, vector<1x4x256xf32>
    %1 = tpu.transpose %0, [0, 2, 1] : vector<1x4x256xf32> -> vector<1x256x4xf32>
    %2 = vector.shape_cast %1 : vector<1x256x4xf32> to vector<1x1024xf32>
    %c0_2 = arith.constant 0 : index
    %c0_3 = arith.constant 0 : index
    %c0_4 = arith.constant 0 : index
    %3 = vector.load %arg3[%c0_2, %c0_3, %c0_4] : memref<1x1x1024xf32, #tpu.memory_space<vmem>>, vector<1x1x1024xf32>
    %4 = vector.shape_cast %3 : vector<1x1x1024xf32> to vector<1x1024xf32>
    %5 = vector.shape_cast %2 : vector<1x1024xf32> to vector<1x1x1024xf32>
    tpu.vector_store %arg3[%c0_2, %c0_3, %c0_4], %5 {strides = array<i32>} : memref<1x1x1024xf32, #tpu.memory_space<vmem>>, vector<1x1x1024xf32>,
    return
  }
  func.func @transform_0(%arg0: i32, %arg1: i32) -> (i32, i32, i32) {
    %c0_i32 = arith.constant 0 : i32
    %c0_i32_0 = arith.constant 0 : i32
    return %arg0, %c0_i32, %arg1 : i32, i32, i32
  }
  func.func @transform_1(%arg0: i32, %arg1: i32) -> (i32, i32, i32) {
    %c0_i32 = arith.constant 0 : i32
    %c0_i32_0 = arith.constant 0 : i32
    return %arg0, %c0_i32, %arg1 : i32, i32, i32
  }
}

</mosaic_0001>

<bundles_post_ra>
// kernel: tpu_custom_call.1
= control target key start
LH: loop header
LB: loop body
LE: loop exit
PB: predicated region body
PF: predicated region fallthrough
CT: control target
= control target key end

     0   :  { %s5007_s0 = inlined_call_operand.hbm [shape: f32[2,4,256], index: 0, kind: input, shape index: {}]   ;;  %s5008_s1 = inlined_call_operand.hbm [shape: f32[2,1,1024], index: 1, kind: output, shape index: {}]  }
   0x1   :  { %5115 = sst [smem:[#allocation121_spill]] %s5007_s0 }
   0x2   :  { %5116 = sst [smem:[#allocation122_spill]] %s5008_s1 }
   0x3   :  { %6 = vsyncpa [#allocation3], 0 }
   0x4   :  { %8 = vsyncpa [#allocation3 + $0x1], 0 }
   0x5   :  { %9 = vsyncpa [#allocation4], 0 }
   0x6   :  { %11 = vsyncpa [#allocation4 + $0x1], 0  ;;  %s3114_s6 = smov 0   ;;  %s3116_s7 = smov 0  }
   0x7   :  { %s3118_s8 = smov 0   ;;  %s3120_s9 = smov 0  }
   0x8   :  { %s3122_s10 = smov 0   ;;  %s3124_s11 = smov 0  }
   0x9 LB: > { %5117 = sst [smem:[#allocation8_spill]] %s3049_s6  ;;  %s2846_s12 = sadd.s32 4294967295, %s3069_s11   ;;  %s3069_s11 = sphi %s3124_s11, %s17_s11   ;;  %s3065_s10 = sphi %s3122_s10, %s5522_s10   ;;  %s3061_s9 = sphi %s3120_s9, %s5521_s9   ;;  %s3057_s8 = sphi %s3118_s8, %s5520_s8   ;;  %s3053_s7 = sphi %s3116_s7, %s5519_s7   ;;  %s3049_s6 = sphi %s3114_s6, %s5518_s6  }
   0xa   : > { %5118 = sst [smem:[#allocation9_spill]] %s3053_s7  ;;  %s2847_s13 = sadd.s32 4294967294, %s3069_s11  }
   0xb   : > { %5119 = sst [smem:[#allocation10_spill]] %s3057_s8  ;;  %s29_s14 = sadd.s32 1, %s3065_s10 }
   0xc   : > { %5120 = sst [smem:[#allocation11_spill]] %s3061_s9  ;;  %s38_s15 = sadd.s32 1, %s3057_s8 }
   0xd   : > { %5121 = sst [smem:[#allocation12_spill]] %s3065_s10  ;;  %p31_p0 = scmp.ge.s32.totalorder %s29_s14, 2 }
   0xe   : > { %5122 = sst [smem:[#allocation13_spill]] %s3069_s11  ;;  %p45_p1 = scmp.ne.s32.totalorder %s3057_s8, %s3053_s7 }
   0xf   : > { %p46_p2 = scmp.eq.s32.totalorder %s3069_s11, 0  ;;  %p51_p3 = scmp.ne.s32.totalorder %s3053_s7, %s3049_s6 }
  0x10   : > { %s5524_s14 = smov (%p31_p0, %s29_s14), 0  ;;  %p52_p5 = scmp.eq.s32.totalorder %s2846_s12, 0 }
  0x11   : > { %5123 = sst [smem:[#allocation14_spill]] %s5524_s14  ;;  %p3155_p4 = por %p46_p2, %p45_p1 }
  0x12   : > { %s33_s17 = ssub.s32 %s3065_s10, %s5524_s14  ;;  %p77_p6 = scmp.eq.s32.totalorder %s2846_s12, 1 }
  0x13   : > { %p36_p7 = scmp.eq.s32.totalorder %s33_s17, 0  ;;  %p3161_p8 = por %p52_p5, %p51_p3 }
  0x14   : > { %p3165_p9 = por %p77_p6, %p45_p1  ;;  %p83_p10 = scmp.eq.s32.totalorder %s2847_s13, 1 }
  0x15   : > { %s3170_s20 = scalar_select %p36_p7, %s3057_s8, %s38_s15  }
  0x16   : > { %s5126_s19 = scalar_select %p3165_p9, 1, 0 }
  0x17   : > { %5128 = sst [smem:[#allocation16_spill]] %s3170_s20  ;;  %p3172_p11 = por %p83_p10, %p51_p3 }
  0x18   : > { %5127 = sst [smem:[#allocation15_spill]] %s5126_s19  ;;  %p2849_p12 = scmp.ge.s32.totalorder %s3069_s11, 2 }
  0x19   : > { %s5129_s21 = scalar_select %p3172_p11, 1, 0 }
  0x1a   : > { %p2873_p13 = scmp.lt.s32.totalorder %s3069_s11, 2  ;;  %s103_s22 = sand.u32 1, %s3057_s8  }
  0x1b   : > { %5130 = sst [smem:[#allocation17_spill]] %s5129_s21  ;;  %s2850_s23 = sshll.u32 %s103_s22, 3 }
  0x1c   : > { %s2860_s24 = sshll.u32 %s3065_s10, 3  ;;  %s5131_s0 = sld [smem:[#allocation121_spill]] }
  0x1d   : > { %s107_s28 = scalar_lea.vmem [#allocation2], %s2850_s23  ;;  %p2866_p0 = pnand %p2873_p13, %p3155_p4 }
  0x1e   : > { %s118_s29 = sshll.u32 %s107_s28, 4  ;;  %p2853_p1 = scmp.ge.s32.totalorder %s3069_s11, 1  ;;  %s119_s29 = int_to_ptr.vmem [resolvable:$true] %s118_s29 }
  0x1f   : > { %p123_p2 = scmp.lt.s32.totalorder %s3069_s11, 3  ;;  %s104_s2 = scalar_lea.sflag [#allocation3], %s103_s22 }
  0x21   : > { %p124_p3 = pnand %p2853_p1, %p123_p2 }
  0x22   : > { %s114_s27 = scalar_lea.hbm %s5131_s0, %s2860_s24 }
  0x23   : > { %s116_s30 = sshll.u32 %s114_s27, 4  ;;  %127 = sbr.rel (%p124_p3) target bundleno = 1125 (0x465), region = 24  ;;  %s117_s30 = int_to_ptr.hbm [resolvable:$true] %s116_s30 }
  0x24   : > { %2868 = dma.hbm_to_vmem [thread:$0]  (!%p2866_p0), %s117_s30, 128, %s119_s29, %s104_s2  }
  0x28   : > { %s3188_s3 = sand.u32 1, %s3053_s7  }
  0x29   : > { %5132 = sst [smem:[#allocation18_spill]] %s3188_s3  ;;  %s5009_s4 = sshll.u32 %s3188_s3, 3 }
  0x2a   : > { %s130_s5 = scalar_lea.sflag [#allocation3], %s3188_s3  ;;  %s133_s12 = scalar_lea.vmem [#allocation2], %s5009_s4 }
  0x2b   : > { %3040 = dma.done.wait (%p3161_p8), %s130_s5, 128  }
  0x2c   : > { %3042 = vsyncadd (%p3161_p8), %s130_s5, 4294967168  ;;  %v155_v0 = vld [vmem:[%s133_s12] sm:$0xff]  ;;  %v3071_v3 = vmov 1983009808   ;;  %v3072_v5 = vmov 1934713408  }
  0x2d   : > { %157 = vst [vmem:[#allocation1] ss:$2 sm:$0xff] %v155_v0  ;;  %v230_v4 = vunpack.c.l.s4 %v3071_v3  ;;  %v240_v6 = vunpack.c.l.s4 %v3072_v5  ;;  %vm227_vm0 = vcmask 1047556   ;;  %s5062_s13 = smov 4   ;;  %s5010_s15 = smov 16   ;;  %vm2435_vm1 = vcmask 31744  }
  0x2e   : > { %s5054_s16 = smov 8   ;;  %s5052_s17 = smov 12   ;;  %vm2437_vm2 = vcmask 64512   ;;  %vm2439_vm3 = vcmask 97280   ;;  %vm2441_vm4 = vcmask 130048   ;;  %vm2443_vm5 = vcmask 162816  }
  0x2f   : > { %v3198_v7 = vunpack.c.0.s8 %v230_v4  ;;  %v3200_v8 = vunpack.c.0.s8 %v240_v6  ;;  %s5050_s18 = smov 20   ;;  %s5048_s22 = smov 24   ;;  %vm5113_vm6 = vcmask 195584   ;;  %vm5112_vm7 = vcmask 228352  }
  0x30   : > { %s5070_s23 = smov 28   ;;  %s5046_s24 = smov 32   ;;  %vm5111_vm8 = vcmask 261120   ;;  %vm5110_vm9 = vcmask 293888   ;;  %vm5109_vm10 = vcmask 326656   ;;  %vm5108_vm11 = vcmask 359424  }
  0x31   : > { %s5044_s25 = smov 36   ;;  %s5058_s26 = smov 40   ;;  %vm5103_vm12 = vcmask 392192   ;;  %vm5095_vm13 = vcmask 424960   ;;  %vm5093_vm14 = vcmask 457728   ;;  %vm5094_vm15 = vcmask 490496  }
  0x32   : > { %s5042_s27 = smov 44   ;;  %s5036_s28 = smov 48  }
  0x33   : > { %s5060_s29 = smov 52   ;;  %s5040_s30 = smov 56  }
  0x34   : > { %v158_v1 = vld.sshfl [vmem:[#allocation1] sm:$0xff pattern:$0x75316420]  ;;  %v159_v2 = vld.sshfl [vmem:[#allocation1 + $0x8] sm:$0xff pattern:$0x75316420] }
  0x35   : > { %162 = vxpose.xlu0.b32.start.end [1/1] (short) %v158_v1, 128  ;;  %s5038_s2 = smov 60   ;;  %s5012_s5 = smov 64  }
  0x36   : > { %s5016_s12 = smov 68   ;;  %s5014_s4 = smov 72  }
  0x37   : > { %s5197_s0 = smov 36   ;;  %s5200_s14 = smov 124  }
  0x38   : > { %s5201_s10 = smov 40   ;;  %s5202_s20 = smov 44  }
  0x39   : > { %s5205_s8 = smov 48   ;;  %s5206_s7 = smov 52  }
  0x3a   : > { %s5209_s11 = smov 56   ;;  %s5210_s21 = smov 60  }
  0x3b   : > { %s5221_s6 = smov 100   ;;  %s5224_s19 = smov 104  }
  0x3c   : > { %s5227_s1 = smov 116   ;;  %s5254_s3 = smov 4  }
  0x3d   : > { %s5258_s9 = smov 28  }
  0xb5   : > { %194 = vxpose.xlu0.b32.start.end [1/1] (short) %v159_v2, 128 }
  0xd9   : > { %v178_v9 = vpop.trf.xlu0 }
  0xda   : > { %v226_v10 = vrot.slane %v178_v9, 4  ;;  %v232_v11 = vperm.slane %v178_v9, %v3198_v7 }
  0xdc   : > { %v237_v12 = vrot.slane %v232_v11, 4  ;;  %v3204_v13 = vperm.slane %v232_v11, %v3200_v8  ;;  %v228_v14 = vsel %vm227_vm0, 0.0, %v226_v10 }
  0xdd   : > { %v236_v15 = vperm.slane %v228_v14, %v3198_v7 }
  0xde   : > { %5133 = vst [vmem:[#allocation19_spill] sm:$0xff] %v3204_v13  ;;  %v257_v16 = vrot.slane %v3204_v13, 4  ;;  %v238_v17 = vsel %vm227_vm0, 0.0, %v237_v12 }
  0xdf   : > { %v252_v18 = vperm.slane %v236_v15, %v3200_v8  ;;  %v246_v20 = vperm.slane %v238_v17, %v3200_v8  ;;  %v247_v22 = vrot.slane %v236_v15, 4 }
  0xe0   : > { %v258_v19 = vsel %vm227_vm0, 0.0, %v257_v16 }
  0xe1   : > { %1444 = vrot.lane.b32.xlu1 %v258_v19, %s5062_s13  ;;  %1456 = vrot.lane.b32.xlu2 %v252_v18, %s5010_s15  ;;  %v259_v21 = vrot.slane %v246_v20, 4  ;;  %v261_v24 = vrot.slane %v252_v18, 4  ;;  %v248_v25 = vsel %vm227_vm0, 0.0, %v247_v22  ;;  %v179_v26 = vpop.trf.xlu0  ;;  %s5020_s15 = smov 76  }
  0xe2   : > { %v256_v27 = vperm.slane %v248_v25, %v3200_v8  ;;  %v270_v29 = vperm.slane %v179_v26, %v3198_v7  ;;  %v265_v36 = vrot.slane %v179_v26, 4 }
  0xe3   : > { %v260_v23 = vsel %vm227_vm0, 0.0, %v259_v21  ;;  %v262_v28 = vsel %vm227_vm0, 0.0, %v261_v24 }
  0xe4   : > { %v263_v30 = vrot.slane %v256_v27, 4  ;;  %v280_v31 = vperm.slane %v270_v29, %v3200_v8  ;;  %v275_v32 = vrot.slane %v270_v29, 4  ;;  %v266_v39 = vsel %vm227_vm0, 0.0, %v265_v36 }
  0xe5   : > { %v274_v40 = vperm.slane %v266_v39, %v3198_v7 }
  0xe6   : > { %v264_v33 = vsel %vm227_vm0, 0.0, %v263_v30  ;;  %v295_v34 = vrot.slane %v280_v31, 4  ;;  %v276_v35 = vsel %vm227_vm0, 0.0, %v275_v32 }
  0xe7   : > { %v284_v37 = vperm.slane %v276_v35, %v3200_v8  ;;  %v290_v42 = vperm.slane %v274_v40, %v3200_v8  ;;  %v285_v44 = vrot.slane %v274_v40, 4 }
  0xe8   : > { %v296_v38 = vsel %vm227_vm0, 0.0, %v295_v34 }
  0xe9   : > { %1448 = vrot.lane.b32.xlu1 %v246_v20, %s5054_s16  ;;  %1452 = vrot.lane.b32.xlu2 %v260_v23, %s5052_s17  ;;  %v297_v41 = vrot.slane %v284_v37, 4  ;;  %v299_v45 = vrot.slane %v290_v42, 4  ;;  %v286_v46 = vsel %vm227_vm0, 0.0, %v285_v44  ;;  %v180_v47 = vpop.trf.xlu0 }
  0xea   : > { %v294_v48 = vperm.slane %v286_v46, %v3200_v8  ;;  %v308_v50 = vperm.slane %v180_v47, %v3198_v7  ;;  %v303_v57 = vrot.slane %v180_v47, 4 }
  0xeb   : > { %v298_v43 = vsel %vm227_vm0, 0.0, %v297_v41  ;;  %v300_v49 = vsel %vm227_vm0, 0.0, %v299_v45 }
  0xec   : > { %v301_v51 = vrot.slane %v294_v48, 4  ;;  %v318_v52 = vperm.slane %v308_v50, %v3200_v8  ;;  %v313_v53 = vrot.slane %v308_v50, 4  ;;  %v304_v60 = vsel %vm227_vm0, 0.0, %v303_v57 }
  0xed   : > { %v312_v61 = vperm.slane %v304_v60, %v3198_v7 }
  0xee   : > { %v302_v54 = vsel %vm227_vm0, 0.0, %v301_v51  ;;  %v333_v55 = vrot.slane %v318_v52, 4  ;;  %v314_v56 = vsel %vm227_vm0, 0.0, %v313_v53 }
  0xef   : > { %v322_v58 = vperm.slane %v314_v56, %v3200_v8  ;;  %v328_v63 = vperm.slane %v312_v61, %v3200_v8  ;;  %v323_v1 = vrot.slane %v312_v61, 4 }
  0xf0   : > { %v334_v59 = vsel %vm227_vm0, 0.0, %v333_v55 }
  0xf1   : > { %1460 = vrot.lane.b32.xlu1 %v262_v28, %s5050_s18  ;;  %1464 = vrot.lane.b32.xlu2 %v256_v27, %s5048_s22  ;;  %v335_v62 = vrot.slane %v322_v58, 4  ;;  %v337_v2 = vrot.slane %v328_v63, 4  ;;  %v324_v3 = vsel %vm227_vm0, 0.0, %v323_v1  ;;  %v181_v5 = vpop.trf.xlu0 }
  0xf2   : > { %v332_v4 = vperm.slane %v324_v3, %v3200_v8  ;;  %v346_v9 = vperm.slane %v181_v5, %v3198_v7  ;;  %v341_v19 = vrot.slane %v181_v5, 4 }
  0xf3   : > { %v336_v0 = vsel %vm227_vm0, 0.0, %v335_v62  ;;  %v338_v6 = vsel %vm227_vm0, 0.0, %v337_v2 }
  0xf4   : > { %v339_v10 = vrot.slane %v332_v4, 4  ;;  %v356_v11 = vperm.slane %v346_v9, %v3200_v8  ;;  %v351_v12 = vrot.slane %v346_v9, 4  ;;  %v342_v22 = vsel %vm227_vm0, 0.0, %v341_v19 }
  0xf5   : > { %v350_v24 = vperm.slane %v342_v22, %v3198_v7 }
  0xf6   : > { %v340_v14 = vsel %vm227_vm0, 0.0, %v339_v10  ;;  %v371_v16 = vrot.slane %v356_v11, 4  ;;  %v352_v17 = vsel %vm227_vm0, 0.0, %v351_v12 }
  0xf7   : > { %v360_v20 = vperm.slane %v352_v17, %v3200_v8  ;;  %v366_v27 = vperm.slane %v350_v24, %v3200_v8  ;;  %v361_v29 = vrot.slane %v350_v24, 4 }
  0xf8   : > { %v372_v21 = vsel %vm227_vm0, 0.0, %v371_v16 }
  0xf9   : > { %1468 = vrot.lane.b32.xlu1 %v264_v33, %s5070_s23  ;;  %1472 = vrot.lane.b32.xlu2 %v280_v31, %s5046_s24  ;;  %v182_v15 = vpop.trf.xlu0  ;;  %v373_v26 = vrot.slane %v360_v20, 4  ;;  %v375_v32 = vrot.slane %v366_v27, 4  ;;  %v362_v33 = vsel %vm227_vm0, 0.0, %v361_v29 }
  0xfa   : > { %v384_v30 = vperm.slane %v182_v15, %v3198_v7  ;;  %v379_v44 = vrot.slane %v182_v15, 4 }
  0xfb   : > { %v374_v28 = vsel %vm227_vm0, 0.0, %v373_v26 }
  0xfc   : > { %v3292_v34 = vperm.slane %v384_v30, %v3200_v8  ;;  %v389_v36 = vrot.slane %v384_v30, 4 }
  0xfe   : > { %5137 = vst [vmem:[#allocation23_spill] sm:$0xff] %v3292_v34  ;;  %v409_v39 = vrot.slane %v3292_v34, 4 }
 0x100   : > { %v410_v45 = vsel %vm227_vm0, 0.0, %v409_v39 }
 0x101   : > { %1476 = vrot.lane.b32.xlu1 %v296_v38, %s5044_s25  ;;  %1480 = vrot.lane.b32.xlu2 %v284_v37, %s5058_s26  ;;  %v3281_v25 = vpop.trf.xlu0  ;;  %v370_v37 = vperm.slane %v362_v33, %v3200_v8  ;;  %v376_v38 = vsel %vm227_vm0, 0.0, %v375_v32 }
 0x102   : > { %v417_v15 = vrot.slane %v3281_v25, 4 }
 0x109   : > { %1484 = vrot.lane.b32.xlu1 %v298_v43, %s5042_s27  ;;  %1488 = vrot.lane.b32.xlu2 %v290_v42, %s5036_s28  ;;  %v3294_v35 = vpop.trf.xlu0  ;;  %v390_v42 = vsel %vm227_vm0, 0.0, %v389_v36  ;;  %v377_v43 = vrot.slane %v370_v37, 4 }
 0x10a   : > { %v398_v46 = vperm.slane %v390_v42, %v3200_v8  ;;  %v460_v39 = vperm.slane %v3294_v35, %v3198_v7 }
 0x10c   : > { %v411_v50 = vrot.slane %v398_v46, 4 }
 0x111   : > { %1492 = vrot.lane.b32.xlu1 %v300_v49, %s5060_s29  ;;  %1496 = vrot.lane.b32.xlu2 %v294_v48, %s5040_s30  ;;  %v3308_v47 = vpop.trf.xlu0  ;;  %v378_v48 = vsel %vm227_vm0, 0.0, %v377_v43  ;;  %v380_v49 = vsel %vm227_vm0, 0.0, %v379_v44 }
 0x112   : > { %v388_v53 = vperm.slane %v380_v49, %v3198_v7 }
 0x114   : > { %v3321_v55 = vperm.slane %v388_v53, %v3200_v8  ;;  %v399_v56 = vrot.slane %v388_v53, 4 }
 0x116   : > { %v413_v60 = vrot.slane %v3321_v55, 4  ;;  %v400_v61 = vsel %vm227_vm0, 0.0, %v399_v56 }
 0x117   : > { %v408_v62 = vperm.slane %v400_v61, %v3200_v8 }
 0x119   : > { %1500 = vrot.lane.b32.xlu1 %v302_v54, %s5038_s2  ;;  %1504 = vrot.lane.b32.xlu2 %v318_v52, %s5012_s5  ;;  %s5018_s5 = smov 80   ;;  %v412_v54 = vsel %vm227_vm0, 0.0, %v411_v50  ;;  %v3325_v57 = vpop.trf.xlu0 }
 0x121   : > { %1508 = vrot.lane.b32.xlu1 %v334_v59, %s5016_s12  ;;  %1512 = vrot.lane.b32.xlu2 %v322_v58, %s5014_s4  ;;  %s5028_s4 = smov 84   ;;  %s5022_s12 = smov 88   ;;  %v3343_v3 = vpop.trf.xlu0 }
 0x129   : > { %1516 = vrot.lane.b32.xlu1 %v336_v0, %s5020_s15  ;;  %1520 = vrot.lane.b32.xlu2 %v328_v63, %s5018_s5  ;;  %s5024_s5 = smov 92   ;;  %s5026_s15 = smov 96   ;;  %v414_v63 = vsel %vm227_vm0, 0.0, %v413_v60  ;;  %v422_v0 = vperm.slane %v3281_v25, %v3198_v7  ;;  %v3356_v17 = vpop.trf.xlu0  ;;  %v455_v60 = vrot.slane %v3294_v35, 4 }
 0x12b   : > { %v432_v5 = vperm.slane %v422_v0, %v3200_v8 }
 0x12d   : > { %v447_v10 = vrot.slane %v432_v5, 4 }
 0x12f   : > { %v448_v19 = vsel %vm227_vm0, 0.0, %v447_v10 }
 0x131   : > { %1524 = vrot.lane.b32.xlu1 %v338_v6, %s5028_s4  ;;  %1528 = vrot.lane.b32.xlu2 %v332_v4, %s5022_s12  ;;  %s5068_s12 = smov 100   ;;  %s5032_s4 = smov 112   ;;  %v415_v4 = vrot.slane %v408_v62, 4  ;;  %v427_v6 = vrot.slane %v422_v0, 4 }
 0x133   : > { %v416_v9 = vsel %vm227_vm0, 0.0, %v415_v4  ;;  %v456_v4 = vsel %vm227_vm0, 0.0, %v455_v60 }
 0x134   : > { %v464_v10 = vperm.slane %v456_v4, %v3198_v7 }
 0x139   : > { %1532 = vrot.lane.b32.xlu1 %v340_v14, %s5024_s5  ;;  %1536 = vrot.lane.b32.xlu2 %v356_v11, %s5026_s15  ;;  %s5056_s5 = smov 104   ;;  %s5030_s15 = smov 108   ;;  %v428_v11 = vsel %vm227_vm0, 0.0, %v427_v6 }
 0x13a   : > { %v436_v16 = vperm.slane %v428_v11, %v3200_v8 }
 0x13b   : > { %v3271_v18 = vpop.permute.xlu2 %1456 }
 0x13c   : > { %5134 = vst [vmem:[#allocation20_spill] sm:$0xff] %v3271_v18  ;;  %v449_v26 = vrot.slane %v436_v16, 4 }
 0x141   : > { %1540 = vrot.lane.b32.xlu1 %v372_v21, %s5068_s12  ;;  %1544 = vrot.lane.b32.xlu2 %v360_v20, %s5056_s5  ;;  %v418_v20 = vsel %vm227_vm0, 0.0, %v417_v15 }
 0x142   : > { %v426_v24 = vperm.slane %v418_v20, %v3198_v7  ;;  %v480_v20 = vperm.slane %v464_v10, %v3200_v8 }
 0x143   : > { %v3278_v23 = vpop.permute.xlu2 %1452 }
 0x144   : > { %5135 = vst [vmem:[#allocation21_spill] sm:$0xff] %v3278_v23  ;;  %v442_v25 = vperm.slane %v426_v24, %v3200_v8  ;;  %v437_v29 = vrot.slane %v426_v24, 4 }
 0x146   : > { %v451_v33 = vrot.slane %v442_v25, 4  ;;  %v438_v36 = vsel %vm227_vm0, 0.0, %v437_v29 }
 0x149   : > { %1548 = vrot.lane.b32.xlu1 %v374_v28, %s5030_s15  ;;  %1552 = vrot.lane.b32.xlu2 %v366_v27, %s5032_s4  ;;  %s5064_s15 = smov 116   ;;  %s5034_s4 = smov 120   ;;  %v3368_v27 = vpop.trf.xlu0  ;;  %v450_v28 = vsel %vm227_vm0, 0.0, %v449_v26 }
 0x14b   : > { %v3288_v31 = vpop.permute.xlu2 %1464 }
 0x14c   : > { %5136 = vst [vmem:[#allocation22_spill] sm:$0xff] %v3288_v31 }
 0x151   : > { %1556 = vrot.lane.b32.xlu1 %v376_v38, %s5064_s15  ;;  %1560 = vrot.lane.b32.xlu2 %v370_v37, %s5034_s4  ;;  %s5066_s4 = smov 124   ;;  %v446_v37 = vperm.slane %v438_v36, %v3200_v8  ;;  %v452_v38 = vsel %vm227_vm0, 0.0, %v451_v33  ;;  %v190_v42 = vpop.trf.xlu0  ;;  %v489_v36 = vrot.slane %v480_v20, 4 }
 0x152   : > { %v3399_v61 = vperm.slane %v190_v42, %v3198_v7 }
 0x153   : > { %v3301_v40 = vpop.permute.xlu1 %1444  ;;  %v3303_v41 = vpop.permute.xlu2 %1472 }
 0x154   : > { %5138 = vst [vmem:[#allocation24_spill] sm:$0xff] %v3301_v40  ;;  %v3406_v6 = vperm.slane %v3399_v61, %v3200_v8 }
 0x155   : > { %5139 = vst [vmem:[#allocation25_spill] sm:$0xff] %v3303_v41 }
 0x159   : > { %1564 = vrot.lane.b32.xlu1 %v378_v48, %s5066_s4  ;;  %1568 = vrot.lane.b32.xlu2 %v410_v45, %s5062_s13  ;;  %v453_v45 = vrot.slane %v446_v37, 4  ;;  %v465_v48 = vrot.slane %v460_v39, 4 }
 0x15b   : > { %v3314_v51 = vpop.permute.xlu1 %1448  ;;  %v3316_v52 = vpop.permute.xlu2 %1480  ;;  %v454_v49 = vsel %vm227_vm0, 0.0, %v453_v45  ;;  %v466_v53 = vsel %vm227_vm0, 0.0, %v465_v48 }
 0x15c   : > { %5140 = vst [vmem:[#allocation26_spill] sm:$0xff] %v3314_v51 }
 0x15d   : > { %5141 = vst [vmem:[#allocation27_spill] sm:$0xff] %v3316_v52 }
 0x161   : > { %1572 = vrot.lane.b32.xlu1 %v398_v46, %s5054_s16  ;;  %1576 = vrot.lane.b32.xlu2 %v412_v54, %s5052_s17  ;;  %v470_v46 = vperm.slane %v460_v39, %v3200_v8  ;;  %s5170_s17 = smov 92   ;;  %s5171_s16 = smov 96  }
 0x163   : > { %v3327_v58 = vpop.permute.xlu1 %1460  ;;  %v3329_v59 = vpop.permute.xlu2 %1488  ;;  %v485_v50 = vrot.slane %v470_v46, 4 }
 0x164   : > { %5142 = vst [vmem:[#allocation28_spill] sm:$0xff] %v3327_v58 }
 0x165   : > { %5143 = vst [vmem:[#allocation29_spill] sm:$0xff] %v3329_v59  ;;  %v486_v0 = vsel %vm227_vm0, 0.0, %v485_v50 }
 0x169   : > { %1584 = vrot.lane.b32.xlu1 %v414_v63, %s5050_s18  ;;  %1588 = vrot.lane.b32.xlu2 %v408_v62, %s5048_s22  ;;  %v191_v62 = vpop.trf.xlu0  ;;  %v474_v63 = vperm.slane %v466_v53, %v3200_v8  ;;  %s5166_s22 = smov 84   ;;  %s5167_s18 = smov 88  }
 0x16a   : > { %v3455_v60 = vperm.slane %v191_v62, %v3198_v7  ;;  %v721_v4 = vrot.slane %v191_v62, 4 }
 0x16b   : > { %v3339_v1 = vpop.permute.xlu1 %1468  ;;  %v3341_v2 = vpop.permute.xlu2 %1496  ;;  %v487_v15 = vrot.slane %v474_v63, 4 }
 0x16c   : > { %5144 = vst [vmem:[#allocation30_spill] sm:$0xff] %v3339_v1 }
 0x16d   : > { %5145 = vst [vmem:[#allocation31_spill] sm:$0xff] %v3341_v2  ;;  %v488_v26 = vsel %vm227_vm0, 0.0, %v487_v15 }
 0x171   : > { %1592 = vrot.lane.b32.xlu1 %v416_v9, %s5070_s23  ;;  %1596 = vrot.lane.b32.xlu2 %v432_v5, %s5046_s24  ;;  %v683_v5 = vrot.slane %v190_v42, 4  ;;  %s5163_s24 = smov 80  }
 0x173   : > { %v3350_v12 = vpop.permute.xlu1 %1476  ;;  %v3352_v14 = vpop.permute.xlu2 %1504  ;;  %v684_v11 = vsel %vm227_vm0, 0.0, %v683_v5 }
 0x174   : > { %5146 = vst [vmem:[#allocation32_spill] sm:$0xff] %v3350_v12  ;;  %v692_v24 = vperm.slane %v684_v11, %v3198_v7  ;;  %v731_v11 = vrot.slane %v3455_v60, 4 }
 0x175   : > { %5147 = vst [vmem:[#allocation33_spill] sm:$0xff] %v3352_v14 }
 0x176   : > { %v3436_v42 = vperm.slane %v692_v24, %v3200_v8 }
 0x179   : > { %1600 = vrot.lane.b32.xlu1 %v448_v19, %s5044_s25  ;;  %1604 = vrot.lane.b32.xlu2 %v436_v16, %s5058_s26  ;;  %v713_v16 = vrot.slane %v3406_v6, 4  ;;  %v3419_v19 = vpop.trf.xlu0  ;;  %s5162_s25 = smov 76  }
 0x17b   : > { %v3362_v21 = vpop.permute.xlu1 %1484  ;;  %v3364_v22 = vpop.permute.xlu2 %1512 }
 0x17c   : > { %5148 = vst [vmem:[#allocation34_spill] sm:$0xff] %v3362_v21 }
 0x17d   : > { %5149 = vst [vmem:[#allocation35_spill] sm:$0xff] %v3364_v22 }
 0x181   : > { %1608 = vrot.lane.b32.xlu1 %v450_v28, %s5042_s27  ;;  %1612 = vrot.lane.b32.xlu2 %v442_v25, %s5036_s28  ;;  %s5154_s28 = smov 64   ;;  %s5161_s27 = smov 16   ;;  %v714_v25 = vsel %vm227_vm0, 0.0, %v713_v16  ;;  %v475_v28 = vrot.slane %v464_v10, 4  ;;  %v3438_v45 = vpop.trf.xlu0 }
 0x183   : > { %v3373_v30 = vpop.permute.xlu1 %1492  ;;  %v3375_v32 = vpop.permute.xlu2 %1520 }
 0x184   : > { %5150 = vst [vmem:[#allocation36_spill] sm:$0xff] %v3373_v30 }
 0x185   : > { %5151 = vst [vmem:[#allocation37_spill] sm:$0xff] %v3375_v32 }
 0x189   : > { %1616 = vrot.lane.b32.xlu1 %v452_v38, %s5060_s29  ;;  %1620 = vrot.lane.b32.xlu2 %v446_v37, %s5040_s30  ;;  %s5158_s30 = smov 72   ;;  %v476_v37 = vsel %vm227_vm0, 0.0, %v475_v28 }
 0x18a   : > { %v484_v39 = vperm.slane %v476_v37, %v3200_v8  ;;  %v732_v37 = vsel %vm227_vm0, 0.0, %v731_v11 }
 0x18b   : > { %v3384_v43 = vpop.permute.xlu1 %1500  ;;  %v3386_v44 = vpop.permute.xlu2 %1528 }
 0x18c   : > { %5152 = vst [vmem:[#allocation38_spill] sm:$0xff] %v3384_v43 }
 0x18d   : > { %5153 = vst [vmem:[#allocation39_spill] sm:$0xff] %v3386_v44 }
 0x191   : > { %1624 = vrot.lane.b32.xlu1 %v454_v49, %s5038_s2  ;;  %1628 = vrot.lane.b32.xlu2 %v470_v46, %s5154_s28  ;;  %s5157_s2 = smov 68   ;;  %v490_v46 = vsel %vm227_vm0, 0.0, %v489_v36  ;;  %v498_v49 = vperm.slane %v3308_v47, %v3198_v7 }
 0x193   : > { %v3393_v54 = vpop.permute.xlu1 %1508  ;;  %v3395_v56 = vpop.permute.xlu2 %1536  ;;  %v508_v5 = vperm.slane %v498_v49, %v3200_v8  ;;  %v503_v10 = vrot.slane %v498_v49, 4 }
 0x194   : > { %5155 = vst [vmem:[#allocation40_spill] sm:$0xff] %v3393_v54 }
 0x195   : > { %5156 = vst [vmem:[#allocation41_spill] sm:$0xff] %v3395_v56  ;;  %v504_v62 = vsel %vm227_vm0, 0.0, %v503_v10 }
 0x199   : > { %1632 = vrot.lane.b32.xlu1 %v486_v0, %s5157_s2  ;;  %1636 = vrot.lane.b32.xlu2 %v474_v63, %s5158_s30  ;;  %v491_v63 = vrot.slane %v484_v39, 4 }
 0x19b   : > { %v3410_v35 = vpop.permute.xlu1 %1516  ;;  %v3412_v9 = vpop.permute.xlu2 %1544  ;;  %1580 = vrot.lane.b32.xlu0 %v3321_v55, %s5161_s27  ;;  %v703_v55 = vrot.slane %v692_v24, 4  ;;  %v492_v15 = vsel %vm227_vm0, 0.0, %v491_v63 }
 0x19c   : > { %5159 = vst [vmem:[#allocation42_spill] sm:$0xff] %v3410_v35  ;;  %v3465_v24 = vpop.trf.xlu0 }
 0x19d   : > { %5160 = vst [vmem:[#allocation43_spill] sm:$0xff] %v3412_v9  ;;  %v704_v38 = vsel %vm227_vm0, 0.0, %v703_v55  ;;  %v493_v55 = vrot.slane %v3308_v47, 4 }
 0x19e   : > { %v3442_v48 = vperm.slane %v704_v38, %v3200_v8  ;;  %v512_v38 = vperm.slane %v504_v62, %v3200_v8 }
 0x19f   : > { %v494_v49 = vsel %vm227_vm0, 0.0, %v493_v55 }
 0x1a0   : > { %v719_v0 = vrot.slane %v3442_v48, 4  ;;  %v525_v10 = vrot.slane %v512_v38, 4 }
 0x1a1   : > { %1640 = vrot.lane.b32.xlu1 %v488_v26, %s5162_s25  ;;  %1644 = vrot.lane.b32.xlu2 %v480_v20, %s5163_s24  ;;  %v722_v20 = vsel %vm227_vm0, 0.0, %v721_v4  ;;  %v523_v26 = vrot.slane %v508_v5, 4  ;;  %v502_v4 = vperm.slane %v494_v49, %v3198_v7 }
 0x1a2   : > { %v720_v16 = vsel %vm227_vm0, 0.0, %v719_v0  ;;  %v3475_v36 = vperm.slane %v722_v20, %v3198_v7  ;;  %v526_v20 = vsel %vm227_vm0, 0.0, %v525_v10 }
 0x1a3   : > { %v3427_v29 = vpop.permute.xlu1 %1524  ;;  %v3429_v33 = vpop.permute.xlu2 %1552  ;;  %1816 = vrot.lane.b32.xlu0 %v714_v25, %s5062_s13  ;;  %v513_v62 = vrot.slane %v502_v4, 4 }
 0x1a4   : > { %5164 = vst [vmem:[#allocation44_spill] sm:$0xff] %v3427_v29  ;;  %v3486_v63 = vperm.slane %v3475_v36, %v3200_v8 }
 0x1a5   : > { %5165 = vst [vmem:[#allocation45_spill] sm:$0xff] %v3429_v33  ;;  %v514_v10 = vsel %vm227_vm0, 0.0, %v513_v62 }
 0x1a6   : > { %v755_v11 = vrot.slane %v3486_v63, 4 }
 0x1a9   : > { %1648 = vrot.lane.b32.xlu1 %v490_v46, %s5166_s22  ;;  %1652 = vrot.lane.b32.xlu2 %v484_v39, %s5167_s18  ;;  %v524_v39 = vsel %vm227_vm0, 0.0, %v523_v26  ;;  %v3481_v46 = vperm.slane %v732_v37, %v3200_v8  ;;  %v756_v26 = vsel %vm227_vm0, 0.0, %v755_v11  ;;  %v536_v37 = vperm.slane %v3325_v57, %v3198_v7 }
 0x1aa   : > { %v759_v11 = vrot.slane %v3419_v19, 4 }
 0x1ab   : > { %v3448_v50 = vpop.permute.xlu1 %1532  ;;  %v3450_v53 = vpop.permute.xlu2 %1560  ;;  %1828 = vrot.lane.b32.xlu0 %v3436_v42, %s5161_s27  ;;  %v541_v33 = vrot.slane %v536_v37, 4 }
 0x1ac   : > { %5168 = vst [vmem:[#allocation46_spill] sm:$0xff] %v3448_v50 }
 0x1ad   : > { %5169 = vst [vmem:[#allocation47_spill] sm:$0xff] %v3450_v53 }
 0x1b1   : > { %1656 = vrot.lane.b32.xlu1 %v492_v15, %s5170_s17  ;;  %1660 = vrot.lane.b32.xlu2 %v508_v5, %s5171_s16  ;;  %v3497_v5 = vpop.trf.xlu0  ;;  %v764_v15 = vperm.slane %v3419_v19, %v3198_v7  ;;  %v760_v19 = vsel %vm227_vm0, 0.0, %v759_v11 }
 0x1b3   : > { %v3468_v25 = vpop.permute.xlu1 %1540  ;;  %v3470_v28 = vpop.permute.xlu2 %1568  ;;  %1840 = vrot.lane.b32.xlu0 %v720_v16, %s5070_s23  ;;  %v518_v16 = vperm.slane %v502_v4, %v3200_v8  ;;  %v769_v55 = vrot.slane %v764_v15, 4 }
 0x1b4   : > { %5172 = vst [vmem:[#allocation48_spill] sm:$0xff] %v3468_v25 }
 0x1b5   : > { %5173 = vst [vmem:[#allocation49_spill] sm:$0xff] %v3470_v28  ;;  %v527_v49 = vrot.slane %v518_v16, 4  ;;  %v770_v4 = vsel %vm227_vm0, 0.0, %v769_v55 }
 0x1b9   : > { %1664 = vrot.lane.b32.xlu1 %v524_v39, %s5068_s12  ;;  %1668 = vrot.lane.b32.xlu2 %v512_v38, %s5056_s5  ;;  %s5176_s5 = smov 108   ;;  %v3520_v53 = vpop.trf.xlu0 }
 0x1bb   : > { %v3490_v47 = vpop.permute.xlu1 %1548  ;;  %v3492_v0 = vpop.permute.xlu2 %1576  ;;  %1852 = vrot.lane.b32.xlu0 %v3481_v46, %s5058_s26  ;;  %s5177_s26 = smov 112  }
 0x1bc   : > { %5174 = vst [vmem:[#allocation50_spill] sm:$0xff] %v3490_v47  ;;  %v522_v47 = vperm.slane %v514_v10, %v3200_v8 }
 0x1bd   : > { %5175 = vst [vmem:[#allocation51_spill] sm:$0xff] %v3492_v0 }
 0x1be   : > { %v529_v10 = vrot.slane %v522_v47, 4 }
 0x1c0   : > { %v530_v25 = vsel %vm227_vm0, 0.0, %v529_v10 }
 0x1c1   : > { %1672 = vrot.lane.b32.xlu1 %v526_v20, %s5176_s5  ;;  %1676 = vrot.lane.b32.xlu2 %v518_v16, %s5177_s26  ;;  %v3518_v20 = vperm.slane %v536_v37, %v3200_v8  ;;  %v3528_v16 = vperm.slane %v770_v4, %v3200_v8  ;;  %v531_v4 = vrot.slane %v3325_v57, 4 }
 0x1c3   : > { %v3509_v38 = vpop.permute.xlu1 %1556  ;;  %v3511_v39 = vpop.permute.xlu2 %1588  ;;  %1864 = vrot.lane.b32.xlu0 %v756_v26, %s5060_s29  ;;  %5180 = vst [vmem:[#allocation54_spill] sm:$0xff] %v3518_v20  ;;  %v528_v26 = vsel %vm227_vm0, 0.0, %v527_v49  ;;  %s5181_s29 = smov 120   ;;  %v561_v62 = vrot.slane %v3518_v20, 4  ;;  %v3542_v49 = vperm.slane %v760_v19, %v3198_v7  ;;  %v791_v11 = vrot.slane %v3528_v16, 4 }
 0x1c4   : > { %5178 = vst [vmem:[#allocation52_spill] sm:$0xff] %v3509_v38  ;;  %v3524_v38 = vperm.slane %v764_v15, %v3200_v8  ;;  %v542_v15 = vsel %vm227_vm0, 0.0, %v541_v33  ;;  %v532_v19 = vsel %vm227_vm0, 0.0, %v531_v4 }
 0x1c5   : > { %5179 = vst [vmem:[#allocation53_spill] sm:$0xff] %v3511_v39  ;;  %v550_v9 = vperm.slane %v542_v15, %v3200_v8  ;;  %v792_v56 = vsel %vm227_vm0, 0.0, %v791_v11  ;;  %v779_v33 = vrot.slane %v3542_v49, 4  ;;  %v3563_v15 = vperm.slane %v3438_v45, %v3198_v7 }
 0x1c6   : > { %v540_v11 = vperm.slane %v532_v19, %v3198_v7  ;;  %v717_v39 = vrot.slane %v3436_v42, 4 }
 0x1c7   : > { %v780_v10 = vsel %vm227_vm0, 0.0, %v779_v33  ;;  %v3574_v50 = vperm.slane %v3563_v15, %v3200_v8 }
 0x1c8   : > { %v551_v33 = vrot.slane %v540_v11, 4 }
 0x1c9   : > { %1680 = vrot.lane.b32.xlu1 %v528_v26, %s5064_s15  ;;  %1684 = vrot.lane.b32.xlu2 %v522_v47, %s5181_s29  ;;  %v562_v26 = vsel %vm227_vm0, 0.0, %v561_v62  ;;  %v563_v47 = vrot.slane %v550_v9, 4  ;;  %s5187_s15 = smov 12   ;;  %v827_v29 = vrot.slane %v3574_v50, 4 }
 0x1ca   : > { %v552_v32 = vsel %vm227_vm0, 0.0, %v551_v33 }
 0x1cb   : > { %v3534_v55 = vpop.permute.xlu1 %1564  ;;  %v3536_v37 = vpop.permute.xlu2 %1596  ;;  %1876 = vrot.lane.b32.xlu0 %v3524_v38, %s5154_s28  ;;  %v564_v4 = vsel %vm227_vm0, 0.0, %v563_v47  ;;  %v560_v35 = vperm.slane %v552_v32, %v3200_v8  ;;  %v3607_v32 = vperm.slane %v3465_v24, %v3198_v7 }
 0x1cc   : > { %5182 = vst [vmem:[#allocation55_spill] sm:$0xff] %v3534_v55  ;;  %v3548_v55 = vpop.trf.xlu0 }
 0x1cd   : > { %5183 = vst [vmem:[#allocation56_spill] sm:$0xff] %v3536_v37  ;;  %v845_v2 = vrot.slane %v3607_v32, 4 }
 0x1d1   : > { %1688 = vrot.lane.b32.xlu1 %v530_v25, %s5066_s4  ;;  %1692 = vrot.lane.b32.xlu2 %v562_v26, %s5062_s13  ;;  %v3569_v25 = vperm.slane %v780_v10, %v3200_v8  ;;  %v797_v26 = vrot.slane %v3438_v45, 4  ;;  %s5186_s13 = smov 8   ;;  %s5190_s4 = smov 20  }
 0x1d3   : > { %v3556_v57 = vpop.permute.xlu1 %1572  ;;  %v3558_v62 = vpop.permute.xlu2 %1604  ;;  %1888 = vrot.lane.b32.xlu0 %v792_v56, %s5162_s25  ;;  %v556_v56 = vperm.slane %v540_v11, %v3200_v8  ;;  %v798_v45 = vsel %vm227_vm0, 0.0, %v797_v26  ;;  %v574_v26 = vperm.slane %v3343_v3, %v3198_v7 }
 0x1d4   : > { %5184 = vst [vmem:[#allocation57_spill] sm:$0xff] %v3556_v57  ;;  %v3579_v44 = vpop.trf.xlu0  ;;  %v4069_v57 = vperm.slane %v3607_v32, %v3200_v8 }
 0x1d5   : > { %5185 = vst [vmem:[#allocation58_spill] sm:$0xff] %v3558_v62  ;;  %v565_v10 = vrot.slane %v556_v56, 4  ;;  %v987_v20 = vrot.slane %v3579_v44, 4 }
 0x1d6   : > { %v865_v32 = vrot.slane %v4069_v57, 4 }
 0x1d7   : > { %v566_v11 = vsel %vm227_vm0, 0.0, %v565_v10 }
 0x1d9   : > { %1696 = vrot.lane.b32.xlu1 %v550_v9, %s5186_s13  ;;  %1700 = vrot.lane.b32.xlu2 %v564_v4, %s5187_s15  ;;  %v806_v9 = vperm.slane %v798_v45, %v3198_v7  ;;  %v828_v4 = vsel %vm227_vm0, 0.0, %v827_v29  ;;  %v567_v45 = vrot.slane %v560_v35, 4 }
 0x1db   : > { %v3581_v19 = vpop.permute.xlu1 %1584  ;;  %v3583_v47 = vpop.permute.xlu2 %1612  ;;  %1900 = vrot.lane.b32.xlu0 %v3569_v25, %s5167_s18  ;;  %v817_v22 = vrot.slane %v806_v9, 4  ;;  %v3612_v10 = vperm.slane %v806_v9, %v3200_v8 }
 0x1dc   : > { %5188 = vst [vmem:[#allocation59_spill] sm:$0xff] %v3581_v19  ;;  %v3603_v33 = vpop.trf.xlu0 }
 0x1dd   : > { %5189 = vst [vmem:[#allocation60_spill] sm:$0xff] %v3583_v47  ;;  %v818_v29 = vsel %vm227_vm0, 0.0, %v817_v22  ;;  %v1025_v19 = vrot.slane %v3603_v33, 4 }
 0x1de   : > { %v3616_v43 = vperm.slane %v818_v29, %v3200_v8 }
 0x1e0   : > { %v833_v9 = vrot.slane %v3616_v43, 4 }
 0x1e1   : > { %1704 = vrot.lane.b32.xlu1 %v556_v56, %s5161_s27  ;;  %1708 = vrot.lane.b32.xlu2 %v566_v11, %s5190_s4  ;;  %v584_v56 = vperm.slane %v574_v26, %v3200_v8  ;;  %v568_v11 = vsel %vm227_vm0, 0.0, %v567_v45  ;;  %v569_v45 = vrot.slane %v3343_v3, 4 }
 0x1e2   : > { %v834_v52 = vsel %vm227_vm0, 0.0, %v833_v9 }
 0x1e3   : > { %v3598_v54 = vpop.permute.xlu1 %1592  ;;  %v3600_v14 = vpop.permute.xlu2 %1620  ;;  %1912 = vrot.lane.b32.xlu0 %v828_v4, %s5068_s12  ;;  %v579_v4 = vrot.slane %v574_v26, 4  ;;  %s5193_s12 = smov 24   ;;  %v599_v30 = vrot.slane %v584_v56, 4  ;;  %v835_v26 = vrot.slane %v3465_v24, 4 }
 0x1e4   : > { %5191 = vst [vmem:[#allocation61_spill] sm:$0xff] %v3598_v54  ;;  %v3632_v21 = vpop.trf.xlu0  ;;  %v988_v54 = vsel %vm227_vm0, 0.0, %v987_v20 }
 0x1e5   : > { %5192 = vst [vmem:[#allocation62_spill] sm:$0xff] %v3600_v14  ;;  %v580_v29 = vsel %vm227_vm0, 0.0, %v579_v4  ;;  %v570_v14 = vsel %vm227_vm0, 0.0, %v569_v45  ;;  %v836_v3 = vsel %vm227_vm0, 0.0, %v835_v26 }
 0x1e6   : > { %v578_v45 = vperm.slane %v570_v14, %v3198_v7  ;;  %v3669_v14 = vperm.slane %v3497_v5, %v3198_v7 }
 0x1e9   : > { %1712 = vrot.lane.b32.xlu1 %v560_v35, %s5193_s12  ;;  %1716 = vrot.lane.b32.xlu2 %v568_v11, %s5070_s23  ;;  %v846_v35 = vsel %vm227_vm0, 0.0, %v845_v2  ;;  %v600_v11 = vsel %vm227_vm0, 0.0, %v599_v30  ;;  %s5196_s23 = smov 32   ;;  %v3650_v30 = vperm.slane %v836_v3, %v3198_v7 }
 0x1ea   : > { %v3638_v12 = vperm.slane %v846_v35, %v3200_v8  ;;  %v594_v35 = vperm.slane %v578_v45, %v3200_v8 }
 0x1eb   : > { %v3621_v59 = vpop.permute.xlu1 %1600  ;;  %v3623_v22 = vpop.permute.xlu2 %1628  ;;  %1924 = vrot.lane.b32.xlu0 %v3612_v10, %s5177_s26 }
 0x1ec   : > { %5194 = vst [vmem:[#allocation63_spill] sm:$0xff] %v3621_v59  ;;  %v867_v9 = vrot.slane %v3638_v12, 4 }
 0x1ed   : > { %5195 = vst [vmem:[#allocation64_spill] sm:$0xff] %v3623_v22  ;;  %v588_v22 = vperm.slane %v580_v29, %v3200_v8  ;;  %v3654_v29 = vpop.trf.xlu0 }
 0x1ee   : > { %v868_v26 = vsel %vm227_vm0, 0.0, %v867_v9 }
 0x1ef   : > { %v601_v4 = vrot.slane %v588_v22, 4 }
 0x1f1   : > { %1720 = vrot.lane.b32.xlu1 %v584_v56, %s5196_s23  ;;  %1724 = vrot.lane.b32.xlu2 %v600_v11, %s5197_s0  ;;  %v602_v56 = vsel %vm227_vm0, 0.0, %v601_v4  ;;  %v855_v11 = vrot.slane %v3650_v30, 4  ;;  %v603_v4 = vrot.slane %v594_v35, 4 }
 0x1f3   : > { %v3644_v2 = vpop.permute.xlu1 %1608  ;;  %v3646_v24 = vpop.permute.xlu2 %1636  ;;  %1936 = vrot.lane.b32.xlu0 %v834_v52, %s5200_s14  ;;  %v589_v52 = vrot.slane %v578_v45, 4  ;;  %v856_v9 = vsel %vm227_vm0, 0.0, %v855_v11  ;;  %v873_v45 = vrot.slane %v3497_v5, 4  ;;  %v612_v11 = vperm.slane %v3356_v17, %v3198_v7 }
 0x1f4   : > { %5198 = vst [vmem:[#allocation65_spill] sm:$0xff] %v3644_v2 }
 0x1f5   : > { %5199 = vst [vmem:[#allocation66_spill] sm:$0xff] %v3646_v24  ;;  %v590_v41 = vsel %vm227_vm0, 0.0, %v589_v52  ;;  %v3687_v52 = vpop.trf.xlu0  ;;  %v617_v47 = vrot.slane %v612_v11, 4 }
 0x1f9   : > { %1728 = vrot.lane.b32.xlu1 %v588_v22, %s5201_s10  ;;  %1732 = vrot.lane.b32.xlu2 %v602_v56, %s5202_s20  ;;  %v3674_v22 = vperm.slane %v856_v9, %v3200_v8  ;;  %v3679_v56 = vperm.slane %v3669_v14, %v3200_v8 }
 0x1fb   : > { %v3662_v3 = vpop.permute.xlu1 %1616  ;;  %v3664_v24 = vpop.permute.xlu2 %1644  ;;  %1948 = vrot.lane.b32.xlu0 %v868_v26, %s5187_s15  ;;  %v604_v26 = vsel %vm227_vm0, 0.0, %v603_v4  ;;  %v874_v4 = vsel %vm227_vm0, 0.0, %v873_v45 }
 0x1fc   : > { %5203 = vst [vmem:[#allocation67_spill] sm:$0xff] %v3662_v3 }
 0x1fd   : > { %5204 = vst [vmem:[#allocation68_spill] sm:$0xff] %v3664_v24  ;;  %v598_v24 = vperm.slane %v590_v41, %v3200_v8  ;;  %v903_v41 = vrot.slane %v3679_v56, 4  ;;  %v3708_v18 = vpop.trf.xlu0 }
 0x1ff   : > { %v605_v3 = vrot.slane %v598_v24, 4  ;;  %v904_v31 = vsel %vm227_vm0, 0.0, %v903_v41 }
 0x201   : > { %1736 = vrot.lane.b32.xlu1 %v594_v35, %s5205_s8  ;;  %1740 = vrot.lane.b32.xlu2 %v604_v26, %s5206_s7  ;;  %v622_v35 = vperm.slane %v612_v11, %v3200_v8  ;;  %v882_v26 = vperm.slane %v874_v4, %v3198_v7  ;;  %v606_v1 = vsel %vm227_vm0, 0.0, %v605_v3  ;;  %v607_v4 = vrot.slane %v3356_v17, 4 }
 0x202   : > { %v618_v3 = vsel %vm227_vm0, 0.0, %v617_v47 }
 0x203   : > { %v3689_v9 = vpop.permute.xlu1 %1624  ;;  %v3691_v5 = vpop.permute.xlu2 %1652  ;;  %1960 = vrot.lane.b32.xlu0 %v3674_v22, %s5193_s12  ;;  %v626_v41 = vperm.slane %v618_v3, %v3200_v8 }
 0x204   : > { %5207 = vst [vmem:[#allocation69_spill] sm:$0xff] %v3689_v9  ;;  %v637_v9 = vrot.slane %v622_v35, 4 }
 0x205   : > { %5208 = vst [vmem:[#allocation70_spill] sm:$0xff] %v3691_v5  ;;  %v893_v5 = vrot.slane %v882_v26, 4  ;;  %v3737_v3 = vpop.trf.xlu0 }
 0x207   : > { %v894_v11 = vsel %vm227_vm0, 0.0, %v893_v5  ;;  %v639_v5 = vrot.slane %v626_v41, 4 }
 0x209   : > { %1744 = vrot.lane.b32.xlu1 %v598_v24, %s5209_s11  ;;  %1748 = vrot.lane.b32.xlu2 %v606_v1, %s5210_s21  ;;  %v638_v24 = vsel %vm227_vm0, 0.0, %v637_v9  ;;  %v3715_v1 = vperm.slane %v882_v26, %v3200_v8  ;;  %v3732_v9 = vperm.slane %v3520_v53, %v3198_v7 }
 0x20b   : > { %v3703_v58 = vpop.permute.xlu1 %1632  ;;  %v3705_v45 = vpop.permute.xlu2 %1660  ;;  %1972 = vrot.lane.b32.xlu0 %v904_v31, %s5197_s0  ;;  %v608_v31 = vsel %vm227_vm0, 0.0, %v607_v4 }
 0x20c   : > { %5211 = vst [vmem:[#allocation71_spill] sm:$0xff] %v3703_v58  ;;  %v3719_v58 = vperm.slane %v894_v11, %v3200_v8  ;;  %v616_v4 = vperm.slane %v608_v31, %v3198_v7  ;;  %v921_v11 = vrot.slane %v3732_v9, 4 }
 0x20d   : > { %5212 = vst [vmem:[#allocation72_spill] sm:$0xff] %v3705_v45 }
 0x20e   : > { %v909_v26 = vrot.slane %v3719_v58, 4  ;;  %v632_v45 = vperm.slane %v616_v4, %v3200_v8  ;;  %v627_v2 = vrot.slane %v616_v4, 4 }
 0x210   : > { %v628_v62 = vsel %vm227_vm0, 0.0, %v627_v2 }
 0x211   : > { %1752 = vrot.lane.b32.xlu1 %v622_v35, %s5154_s28  ;;  %1756 = vrot.lane.b32.xlu2 %v638_v24, %s5157_s2  ;;  %v911_v35 = vrot.slane %v3520_v53, 4  ;;  %v640_v24 = vsel %vm227_vm0, 0.0, %v639_v5  ;;  %v922_v5 = vsel %vm227_vm0, 0.0, %v921_v11  ;;  %v650_v11 = vperm.slane %v3368_v27, %v3198_v7 }
 0x213   : > { %v3724_v17 = vpop.permute.xlu1 %1640  ;;  %v3726_v47 = vpop.permute.xlu2 %1668  ;;  %1984 = vrot.lane.b32.xlu0 %v3715_v1, %s5205_s8 }
 0x214   : > { %5213 = vst [vmem:[#allocation73_spill] sm:$0xff] %v3724_v17  ;;  %v912_v17 = vsel %vm227_vm0, 0.0, %v911_v35  ;;  %v3757_v35 = vperm.slane %v922_v5, %v3200_v8 }
 0x215   : > { %5214 = vst [vmem:[#allocation74_spill] sm:$0xff] %v3726_v47  ;;  %v910_v47 = vsel %vm227_vm0, 0.0, %v909_v26  ;;  %v3752_v23 = vperm.slane %v912_v17, %v3198_v7  ;;  %v641_v26 = vrot.slane %v632_v45, 4 }
 0x217   : > { %v642_v4 = vsel %vm227_vm0, 0.0, %v641_v26  ;;  %v954_v26 = vperm.slane %v3548_v55, %v3198_v7 }
 0x219   : > { %1760 = vrot.lane.b32.xlu1 %v626_v41, %s5158_s30  ;;  %1764 = vrot.lane.b32.xlu2 %v640_v24, %s5162_s25  ;;  %v3759_v41 = vpop.trf.xlu0  ;;  %v636_v24 = vperm.slane %v628_v62, %v3200_v8 }
 0x21b   : > { %v3746_v31 = vpop.permute.xlu1 %1648  ;;  %v3748_v53 = vpop.permute.xlu2 %1676  ;;  %1996 = vrot.lane.b32.xlu0 %v910_v47, %s5210_s21  ;;  %v3765_v47 = vperm.slane %v3752_v23, %v3200_v8  ;;  %v643_v5 = vrot.slane %v636_v24, 4 }
 0x21c   : > { %5215 = vst [vmem:[#allocation75_spill] sm:$0xff] %v3746_v31 }
 0x21d   : > { %5216 = vst [vmem:[#allocation76_spill] sm:$0xff] %v3748_v53  ;;  %v945_v62 = vrot.slane %v3765_v47, 4  ;;  %v660_v53 = vperm.slane %v650_v11, %v3200_v8 }
 0x21f   : > { %v675_v13 = vrot.slane %v660_v53, 4 }
 0x221   : > { %1768 = vrot.lane.b32.xlu1 %v632_v45, %s5163_s24  ;;  %1772 = vrot.lane.b32.xlu2 %v642_v4, %s5166_s22  ;;  %v644_v45 = vsel %vm227_vm0, 0.0, %v643_v5  ;;  %v946_v4 = vsel %vm227_vm0, 0.0, %v945_v62  ;;  %v3785_v31 = vpop.trf.xlu0  ;;  %v645_v5 = vrot.slane %v3368_v27, 4  ;;  %v949_v62 = vrot.slane %v3548_v55, 4 }
 0x223   : > { %v3769_v17 = vpop.permute.xlu1 %1656  ;;  %v3771_v2 = vpop.permute.xlu2 %1684  ;;  %2008 = vrot.lane.b32.xlu0 %v3757_v35, %s5158_s30  ;;  %v950_v27 = vsel %vm227_vm0, 0.0, %v949_v62 }
 0x224   : > { %5217 = vst [vmem:[#allocation77_spill] sm:$0xff] %v3769_v17  ;;  %v655_v17 = vrot.slane %v650_v11, 4 }
 0x225   : > { %5218 = vst [vmem:[#allocation78_spill] sm:$0xff] %v3771_v2  ;;  %v959_v2 = vrot.slane %v954_v26, 4 }
 0x226   : > { %v656_v40 = vsel %vm227_vm0, 0.0, %v655_v17 }
 0x227   : > { %v960_v11 = vsel %vm227_vm0, 0.0, %v959_v2 }
 0x228   : > { %v3802_v37 = vperm.slane %v960_v11, %v3200_v8 }
 0x229   : > { %1776 = vrot.lane.b32.xlu1 %v636_v24, %s5167_s18  ;;  %1780 = vrot.lane.b32.xlu2 %v644_v45, %s5170_s17  ;;  %v3797_v24 = vperm.slane %v954_v26, %v3200_v8  ;;  %v676_v45 = vsel %vm227_vm0, 0.0, %v675_v13  ;;  %v3815_v13 = vperm.slane %v950_v27, %v3198_v7 }
 0x22a   : > { %v981_v26 = vrot.slane %v3802_v37, 4 }
 0x22b   : > { %v3787_v51 = vpop.permute.xlu1 %1664  ;;  %v3789_v59 = vpop.permute.xlu2 %1692  ;;  %2020 = vrot.lane.b32.xlu0 %v946_v4, %s5166_s22  ;;  %v646_v4 = vsel %vm227_vm0, 0.0, %v645_v5 }
 0x22c   : > { %5219 = vst [vmem:[#allocation79_spill] sm:$0xff] %v3787_v51  ;;  %v664_v51 = vperm.slane %v656_v40, %v3200_v8  ;;  %v3817_v40 = vpop.trf.xlu0  ;;  %v654_v5 = vperm.slane %v646_v4, %v3198_v7  ;;  %v982_v11 = vsel %vm227_vm0, 0.0, %v981_v26  ;;  %v3834_v4 = vperm.slane %v3579_v44, %v3198_v7 }
 0x22d   : > { %5220 = vst [vmem:[#allocation80_spill] sm:$0xff] %v3789_v59 }
 0x22e   : > { %v677_v2 = vrot.slane %v664_v51, 4  ;;  %v665_v27 = vrot.slane %v654_v5, 4 }
 0x230   : > { %v678_v62 = vsel %vm227_vm0, 0.0, %v677_v2 }
 0x231   : > { %1784 = vrot.lane.b32.xlu1 %v660_v53, %s5171_s16  ;;  %1788 = vrot.lane.b32.xlu2 %v676_v45, %s5221_s6  ;;  %v969_v53 = vrot.slane %v3815_v13, 4  ;;  %v670_v45 = vperm.slane %v654_v5, %v3200_v8 }
 0x233   : > { %v3808_v55 = vpop.permute.xlu1 %1672  ;;  %v3810_v17 = vpop.permute.xlu2 %1700  ;;  %2032 = vrot.lane.b32.xlu0 %v3797_v24, %s5171_s16  ;;  %v679_v2 = vrot.slane %v670_v45, 4  ;;  %v970_v26 = vsel %vm227_vm0, 0.0, %v969_v53 }
 0x234   : > { %5222 = vst [vmem:[#allocation81_spill] sm:$0xff] %v3808_v55  ;;  %v3839_v59 = vpop.trf.xlu0  ;;  %v3842_v5 = vperm.slane %v970_v26, %v3200_v8 }
 0x235   : > { %5223 = vst [vmem:[#allocation82_spill] sm:$0xff] %v3810_v17 }
 0x239   : > { %1792 = vrot.lane.b32.xlu1 %v664_v51, %s5224_s19  ;;  %1796 = vrot.lane.b32.xlu2 %v678_v62, %s5176_s5  ;;  %v666_v51 = vsel %vm227_vm0, 0.0, %v665_v27  ;;  %v997_v62 = vrot.slane %v3834_v4, 4  ;;  %v3858_v27 = vperm.slane %v988_v54, %v3198_v7 }
 0x23b   : > { %v3827_v55 = vpop.permute.xlu1 %1680  ;;  %v3829_v17 = vpop.permute.xlu2 %1708  ;;  %2044 = vrot.lane.b32.xlu0 %v982_v11, %s5176_s5  ;;  %v680_v11 = vsel %vm227_vm0, 0.0, %v679_v2  ;;  %v998_v2 = vsel %vm227_vm0, 0.0, %v997_v62 }
 0x23c   : > { %5225 = vst [vmem:[#allocation83_spill] sm:$0xff] %v3827_v55  ;;  %v674_v55 = vperm.slane %v666_v51, %v3200_v8  ;;  %v3863_v20 = vperm.slane %v998_v2, %v3200_v8 }
 0x23d   : > { %5226 = vst [vmem:[#allocation84_spill] sm:$0xff] %v3829_v17  ;;  %v693_v17 = vrot.slane %v3399_v61, 4 }
 0x23e   : > { %v681_v26 = vrot.slane %v674_v55, 4 }
 0x23f   : > { %v694_v61 = vsel %vm227_vm0, 0.0, %v693_v17 }
 0x240   : > { %v682_v51 = vsel %vm227_vm0, 0.0, %v681_v26  ;;  %v1030_v26 = vperm.slane %v3603_v33, %v3198_v7 }
 0x241   : > { %1800 = vrot.lane.b32.xlu1 %v670_v45, %s5177_s26  ;;  %1804 = vrot.lane.b32.xlu2 %v680_v11, %s5227_s1  ;;  %v3865_v45 = vpop.trf.xlu0  ;;  %v702_v11 = vperm.slane %v694_v61, %v3200_v8 }
 0x243   : > { %v3851_v44 = vpop.permute.xlu1 %1688  ;;  %v3853_v53 = vpop.permute.xlu2 %1716  ;;  %2056 = vrot.lane.b32.xlu0 %v3842_v5, %s5181_s29  ;;  %v715_v62 = vrot.slane %v702_v11, 4 }
 0x244   : > { %5228 = vst [vmem:[#allocation85_spill] sm:$0xff] %v3851_v44  ;;  %v3871_v44 = vperm.slane %v3858_v27, %v3200_v8 }
 0x245   : > { %5229 = vst [vmem:[#allocation86_spill] sm:$0xff] %v3853_v53  ;;  %v716_v61 = vsel %vm227_vm0, 0.0, %v715_v62 }
 0x246   : > { %v1021_v2 = vrot.slane %v3871_v44, 4 }
 0x248   : > { %v1022_v53 = vsel %vm227_vm0, 0.0, %v1021_v2  ;;  %v3899_v2 = vperm.slane %v1030_v26, %v3200_v8 }
 0x249   : > { %1808 = vrot.lane.b32.xlu1 %v674_v55, %s5181_s29  ;;  %1812 = vrot.lane.b32.xlu2 %v682_v51, %s5200_s14  ;;  %v1035_v55 = vrot.slane %v1030_v26, 4  ;;  %v3888_v51 = vpop.permute.xlu0 %1580 }
 0x24a   : > { %5232 = vst [vmem:[#allocation89_spill] sm:$0xff] %v3888_v51 }
 0x24b   : > { %v3875_v54 = vpop.permute.xlu1 %1696  ;;  %v3877_v17 = vpop.permute.xlu2 %1724  ;;  %2068 = vrot.lane.b32.xlu0 %v3863_v20, %s5186_s13  ;;  %v1036_v62 = vsel %vm227_vm0, 0.0, %v1035_v55 }
 0x24c   : > { %5230 = vst [vmem:[#allocation87_spill] sm:$0xff] %v3875_v54 }
 0x24d   : > { %5231 = vst [vmem:[#allocation88_spill] sm:$0xff] %v3877_v17 }
 0x251   : > { %1820 = vrot.lane.b32.xlu1 %v702_v11, %s5186_s13  ;;  %1824 = vrot.lane.b32.xlu2 %v716_v61, %s5187_s15  ;;  %v718_v11 = vsel %vm227_vm0, 0.0, %v717_v39  ;;  %v736_v61 = vperm.slane %v3455_v60, %v3200_v8  ;;  %v3920_v60 = vpop.permute.xlu0 %1816 }
 0x253   : > { %v3890_v17 = vpop.permute.xlu1 %1704  ;;  %v3892_v54 = vpop.permute.xlu2 %1732  ;;  %2080 = vrot.lane.b32.xlu0 %v1022_v53, %s5190_s4  ;;  %v751_v53 = vrot.slane %v736_v61, 4 }
 0x254   : > { %5233 = vst [vmem:[#allocation90_spill] sm:$0xff] %v3890_v17  ;;  %v3905_v17 = vperm.slane %v1036_v62, %v3200_v8  ;;  %v741_v62 = vrot.slane %v3475_v36, 4 }
 0x255   : > { %5234 = vst [vmem:[#allocation91_spill] sm:$0xff] %v3892_v54  ;;  %v1026_v54 = vsel %vm227_vm0, 0.0, %v1025_v19  ;;  %v752_v55 = vsel %vm227_vm0, 0.0, %v751_v53  ;;  %v753_v53 = vrot.slane %v3481_v46, 4 }
 0x256   : > { %v3918_v39 = vperm.slane %v1026_v54, %v3198_v7  ;;  %v1057_v19 = vrot.slane %v3905_v17, 4  ;;  %v742_v36 = vsel %vm227_vm0, 0.0, %v741_v62 }
 0x258   : > { %v1045_v26 = vrot.slane %v3918_v39, 4 }
 0x259   : > { %1832 = vrot.lane.b32.xlu1 %v718_v11, %s5190_s4  ;;  %1836 = vrot.lane.b32.xlu2 %v3442_v48, %s5193_s12  ;;  %v1058_v48 = vsel %vm227_vm0, 0.0, %v1057_v19 }
 0x25a   : > { %v1046_v19 = vsel %vm227_vm0, 0.0, %v1045_v26 }
 0x25b   : > { %v3911_v42 = vpop.permute.xlu1 %1712  ;;  %v3913_v33 = vpop.permute.xlu2 %1740  ;;  %2092 = vrot.lane.b32.xlu0 %v3899_v2, %s5196_s23 }
 0x25c   : > { %5235 = vst [vmem:[#allocation92_spill] sm:$0xff] %v3911_v42  ;;  %v3941_v42 = vpop.permute.xlu0 %1828 }
 0x25d   : > { %5236 = vst [vmem:[#allocation93_spill] sm:$0xff] %v3913_v33  ;;  %v3936_v33 = vperm.slane %v3632_v21, %v3198_v7 }
 0x261   : > { %1844 = vrot.lane.b32.xlu1 %v736_v61, %s5196_s23  ;;  %1848 = vrot.lane.b32.xlu2 %v752_v55, %s5197_s0  ;;  %v3944_v61 = vperm.slane %v1046_v19, %v3200_v8  ;;  %v1063_v55 = vrot.slane %v3632_v21, 4 }
 0x263   : > { %v3929_v11 = vpop.permute.xlu1 %1720  ;;  %v3931_v54 = vpop.permute.xlu2 %1748  ;;  %2104 = vrot.lane.b32.xlu0 %v1058_v48, %s5202_s20  ;;  %v3949_v48 = vperm.slane %v3936_v33, %v3200_v8  ;;  %v1064_v21 = vsel %vm227_vm0, 0.0, %v1063_v55  ;;  %v789_v55 = vrot.slane %v3524_v38, 4 }
 0x264   : > { %5237 = vst [vmem:[#allocation94_spill] sm:$0xff] %v3929_v11  ;;  %v750_v11 = vperm.slane %v742_v36, %v3200_v8  ;;  %v3965_v36 = vpop.permute.xlu0 %1840 }
 0x265   : > { %5238 = vst [vmem:[#allocation95_spill] sm:$0xff] %v3931_v54  ;;  %v754_v54 = vsel %vm227_vm0, 0.0, %v753_v53  ;;  %v1093_v19 = vrot.slane %v3949_v48, 4  ;;  %v1072_v53 = vperm.slane %v1064_v21, %v3198_v7  ;;  %v790_v0 = vsel %vm227_vm0, 0.0, %v789_v55 }
 0x266   : > { %v757_v62 = vrot.slane %v750_v11, 4  ;;  %v807_v55 = vrot.slane %v3563_v15, 4  ;;  %v795_v15 = vrot.slane %v3569_v25, 4 }
 0x269   : > { %1856 = vrot.lane.b32.xlu1 %v754_v54, %s5202_s20  ;;  %1860 = vrot.lane.b32.xlu2 %v3486_v63, %s5205_s8  ;;  %v758_v54 = vsel %vm227_vm0, 0.0, %v757_v62  ;;  %v1094_v63 = vsel %vm227_vm0, 0.0, %v1093_v19  ;;  %v784_v62 = vperm.slane %v3542_v49, %v3200_v8 }
 0x26b   : > { %v3956_v46 = vpop.permute.xlu1 %1728  ;;  %v3958_v26 = vpop.permute.xlu2 %1756  ;;  %2116 = vrot.lane.b32.xlu0 %v3944_v61, %s5209_s11  ;;  %v793_v49 = vrot.slane %v784_v62, 4 }
 0x26c   : > { %5239 = vst [vmem:[#allocation96_spill] sm:$0xff] %v3956_v46  ;;  %v3987_v19 = vpop.permute.xlu0 %1852 }
 0x26d   : > { %5240 = vst [vmem:[#allocation97_spill] sm:$0xff] %v3958_v26  ;;  %v1083_v26 = vrot.slane %v1072_v53, 4 }
 0x26f   : > { %v1084_v21 = vsel %vm227_vm0, 0.0, %v1083_v26 }
 0x271   : > { %1868 = vrot.lane.b32.xlu1 %v750_v11, %s5209_s11  ;;  %1872 = vrot.lane.b32.xlu2 %v758_v54, %s5210_s21  ;;  %v3985_v11 = vperm.slane %v1072_v53, %v3200_v8  ;;  %v3990_v54 = vperm.slane %v1084_v21, %v3200_v8  ;;  %v1101_v53 = vrot.slane %v3654_v29, 4 }
 0x273   : > { %v3971_v46 = vpop.permute.xlu1 %1736  ;;  %v3973_v51 = vpop.permute.xlu2 %1764  ;;  %2128 = vrot.lane.b32.xlu0 %v1094_v63, %s5157_s2  ;;  %v794_v63 = vsel %vm227_vm0, 0.0, %v793_v49 }
 0x274   : > { %5241 = vst [vmem:[#allocation98_spill] sm:$0xff] %v3971_v46 }
 0x275   : > { %5242 = vst [vmem:[#allocation99_spill] sm:$0xff] %v3973_v51  ;;  %v1102_v51 = vsel %vm227_vm0, 0.0, %v1101_v53 }
 0x276   : > { %v4021_v49 = vperm.slane %v1102_v51, %v3198_v7 }
 0x278   : > { %v4034_v25 = vperm.slane %v4021_v49, %v3200_v8 }
 0x279   : > { %1880 = vrot.lane.b32.xlu1 %v790_v0, %s5157_s2  ;;  %1884 = vrot.lane.b32.xlu2 %v3528_v16, %s5158_s30  ;;  %v4000_v0 = vperm.slane %v3654_v29, %v3198_v7  ;;  %v1099_v16 = vrot.slane %v3990_v54, 4  ;;  %v4016_v29 = vpop.permute.xlu0 %1864 }
 0x27b   : > { %v3992_v38 = vpop.permute.xlu1 %1744  ;;  %v3994_v26 = vpop.permute.xlu2 %1772  ;;  %2140 = vrot.lane.b32.xlu0 %v3985_v11, %s5163_s24  ;;  %v1111_v21 = vrot.slane %v4000_v0, 4 }
 0x27c   : > { %5243 = vst [vmem:[#allocation100_spill] sm:$0xff] %v3992_v38 }
 0x27d   : > { %5244 = vst [vmem:[#allocation101_spill] sm:$0xff] %v3994_v26  ;;  %v1100_v26 = vsel %vm227_vm0, 0.0, %v1099_v16  ;;  %v796_v16 = vsel %vm227_vm0, 0.0, %v795_v15  ;;  %v4044_v15 = vperm.slane %v3687_v52, %v3198_v7 }
 0x281   : > { %1892 = vrot.lane.b32.xlu1 %v784_v62, %s5163_s24  ;;  %1896 = vrot.lane.b32.xlu2 %v794_v63, %s5166_s22  ;;  %v808_v62 = vsel %vm227_vm0, 0.0, %v807_v55  ;;  %v1112_v63 = vsel %vm227_vm0, 0.0, %v1111_v21 }
 0x282   : > { %v816_v53 = vperm.slane %v808_v62, %v3200_v8  ;;  %v1135_v62 = vrot.slane %v4034_v25, 4 }
 0x283   : > { %v4011_v38 = vpop.permute.xlu1 %1752  ;;  %v4013_v46 = vpop.permute.xlu2 %1780  ;;  %2152 = vrot.lane.b32.xlu0 %v1100_v26, %s5170_s17  ;;  %v4030_v26 = vperm.slane %v1112_v63, %v3200_v8  ;;  %v1139_v63 = vrot.slane %v3687_v52, 4 }
 0x284   : > { %5245 = vst [vmem:[#allocation102_spill] sm:$0xff] %v4011_v38  ;;  %v829_v21 = vrot.slane %v816_v53, 4 }
 0x285   : > { %5246 = vst [vmem:[#allocation103_spill] sm:$0xff] %v4013_v46  ;;  %v1136_v46 = vsel %vm227_vm0, 0.0, %v1135_v62  ;;  %v1140_v52 = vsel %vm227_vm0, 0.0, %v1139_v63 }
 0x289   : > { %1904 = vrot.lane.b32.xlu1 %v796_v16, %s5170_s17  ;;  %1908 = vrot.lane.b32.xlu2 %v3574_v50, %s5171_s16  ;;  %v4046_v50 = vpop.permute.xlu0 %1876  ;;  %v830_v16 = vsel %vm227_vm0, 0.0, %v829_v21  ;;  %v831_v21 = vrot.slane %v3612_v10, 4 }
 0x28b   : > { %v4036_v51 = vpop.permute.xlu1 %1760  ;;  %v4038_v55 = vpop.permute.xlu2 %1788  ;;  %2164 = vrot.lane.b32.xlu0 %v4030_v26, %s5224_s19  ;;  %v832_v62 = vsel %vm227_vm0, 0.0, %v831_v21  ;;  %v866_v21 = vsel %vm227_vm0, 0.0, %v865_v32  ;;  %v4107_v32 = vperm.slane %v3708_v18, %v3198_v7 }
 0x28c   : > { %5247 = vst [vmem:[#allocation104_spill] sm:$0xff] %v4036_v51 }
 0x28d   : > { %5248 = vst [vmem:[#allocation105_spill] sm:$0xff] %v4038_v55  ;;  %v4055_v55 = vperm.slane %v4044_v15, %v3200_v8 }
 0x28f   : > { %5249 = vst [vmem:[#allocation106_spill] sm:$0xff] %v4055_v55 }
 0x291   : > { %1916 = vrot.lane.b32.xlu1 %v816_v53, %s5224_s19  ;;  %1920 = vrot.lane.b32.xlu2 %v830_v16, %s5176_s5  ;;  %v1169_v53 = vrot.slane %v4055_v55, 4  ;;  %v1148_v16 = vperm.slane %v1140_v52, %v3198_v7  ;;  %v4071_v34 = vpop.permute.xlu0 %1888 }
 0x293   : > { %v4058_v51 = vpop.permute.xlu1 %1768  ;;  %v4060_v38 = vpop.permute.xlu2 %1796  ;;  %2176 = vrot.lane.b32.xlu0 %v1136_v46, %s5227_s1  ;;  %v1170_v46 = vsel %vm227_vm0, 0.0, %v1169_v53  ;;  %v1159_v10 = vrot.slane %v1148_v16, 4 }
 0x294   : > { %5250 = vst [vmem:[#allocation107_spill] sm:$0xff] %v4058_v51 }
 0x295   : > { %5251 = vst [vmem:[#allocation108_spill] sm:$0xff] %v4060_v38  ;;  %v1160_v52 = vsel %vm227_vm0, 0.0, %v1159_v10 }
 0x299   : > { %1928 = vrot.lane.b32.xlu1 %v832_v62, %s5227_s1  ;;  %1932 = vrot.lane.b32.xlu2 %v3616_v43, %s5181_s29  ;;  %v860_v62 = vperm.slane %v3650_v30, %v3200_v8  ;;  %v4092_v43 = vperm.slane %v1148_v16, %v3200_v8  ;;  %v4094_v53 = vpop.permute.xlu0 %1900  ;;  %v1177_v16 = vrot.slane %v3708_v18, 4 }
 0x29b   : > { %v4078_v63 = vpop.permute.xlu1 %1776  ;;  %v4080_v38 = vpop.permute.xlu2 %1804  ;;  %2188 = vrot.lane.b32.xlu0 %v1170_v46, %s5254_s3  ;;  %v4097_v46 = vperm.slane %v1160_v52, %v3200_v8  ;;  %v869_v30 = vrot.slane %v860_v62, 4  ;;  %v883_v52 = vrot.slane %v3669_v14, 4 }
 0x29c   : > { %5252 = vst [vmem:[#allocation109_spill] sm:$0xff] %v4078_v63  ;;  %v1178_v63 = vsel %vm227_vm0, 0.0, %v1177_v16 }
 0x29d   : > { %5253 = vst [vmem:[#allocation110_spill] sm:$0xff] %v4080_v38  ;;  %v884_v14 = vsel %vm227_vm0, 0.0, %v883_v52 }
 0x29e   : > { %v892_v16 = vperm.slane %v884_v14, %v3200_v8 }
 0x2a1   : > { %1940 = vrot.lane.b32.xlu1 %v866_v21, %s5254_s3  ;;  %1944 = vrot.lane.b32.xlu2 %v3638_v12, %s5186_s13  ;;  %v1175_v12 = vrot.slane %v4097_v46, 4  ;;  %v870_v21 = vsel %vm227_vm0, 0.0, %v869_v30  ;;  %v4121_v18 = vpop.permute.xlu0 %1912  ;;  %v871_v30 = vrot.slane %v3674_v22, 4 }
 0x2a3   : > { %v4099_v38 = vpop.permute.xlu1 %1784  ;;  %v4101_v10 = vpop.permute.xlu2 %1812  ;;  %2200 = vrot.lane.b32.xlu0 %v4092_v43, %s5161_s27 }
 0x2a4   : > { %5255 = vst [vmem:[#allocation111_spill] sm:$0xff] %v4099_v38  ;;  %v1176_v38 = vsel %vm227_vm0, 0.0, %v1175_v12  ;;  %v872_v12 = vsel %vm227_vm0, 0.0, %v871_v30 }
 0x2a5   : > { %5256 = vst [vmem:[#allocation112_spill] sm:$0xff] %v4101_v10  ;;  %v1187_v10 = vrot.slane %v4107_v32, 4 }
 0x2a9   : > { %1952 = vrot.lane.b32.xlu1 %v860_v62, %s5161_s27  ;;  %1956 = vrot.lane.b32.xlu2 %v870_v21, %s5190_s4  ;;  %v4126_v62 = vperm.slane %v1178_v63, %v3198_v7  ;;  %v1188_v21 = vsel %vm227_vm0, 0.0, %v1187_v10  ;;  %v905_v10 = vrot.slane %v892_v16, 4  ;;  %v4145_v30 = vpop.permute.xlu0 %1924 }
 0x2ab   : > { %v4118_v51 = vpop.permute.xlu1 %1792  ;;  %v1825_v28 = vpop.permute.xlu2 %1824  ;;  %2212 = vrot.lane.b32.xlu0 %v1176_v38, %s5258_s9  ;;  %5259 = vst [vmem:[#allocation114_spill] sm:$0xff] %v4126_v62  ;;  %v4135_v38 = vperm.slane %v1188_v21, %v3200_v8  ;;  %v4139_v22 = vperm.slane %v4126_v62, %v3200_v8  ;;  %v906_v21 = vsel %vm227_vm0, 0.0, %v905_v10 }
 0x2ac   : > { %5257 = vst [vmem:[#allocation113_spill] sm:$0xff] %v4118_v51 }
 0x2ad   : > { %5260 = vst [vmem:[#allocation115_spill] sm:$0xff] %v4135_v38  ;;  %v1211_v14 = vrot.slane %v4139_v22, 4 }
 0x2ae   : > { %5261 = vst [vmem:[#allocation116_spill] sm:$0xff] %v4139_v22  ;;  %v907_v22 = vrot.slane %v3715_v1, 4 }
 0x2b1   : > { %1964 = vrot.lane.b32.xlu1 %v872_v12, %s5258_s9  ;;  %1968 = vrot.lane.b32.xlu2 %v3679_v56, %s5196_s23  ;;  %v1220_v56 = vperm.slane %v3737_v3, %v3198_v7  ;;  %v1212_v12 = vsel %vm227_vm0, 0.0, %v1211_v14  ;;  %v4164_v10 = vpop.permute.xlu0 %1936  ;;  %v908_v14 = vsel %vm227_vm0, 0.0, %v907_v22 }
 0x2b2   : > { %5264 = vst [vmem:[#allocation119_spill] sm:$0xff] %v4164_v10 }
 0x2b3   : > { %v4141_v63 = vpop.permute.xlu1 %1800  ;;  %v1837_v52 = vpop.permute.xlu2 %1836  ;;  %2224 = vrot.lane.b32.xlu0 %v4135_v38, %s5201_s10  ;;  %v1215_v38 = vrot.slane %v3737_v3, 4 }
 0x2b4   : > { %5262 = vst [vmem:[#allocation117_spill] sm:$0xff] %v4141_v63  ;;  %v1225_v63 = vrot.slane %v1220_v56, 4 }
 0x2b5   : > { %v1216_v3 = vsel %vm227_vm0, 0.0, %v1215_v38 }
 0x2b6   : > { %v1226_v62 = vsel %vm227_vm0, 0.0, %v1225_v63  ;;  %v4182_v22 = vperm.slane %v1216_v3, %v3198_v7 }
 0x2b7   : > { %v4174_v1 = vperm.slane %v1226_v62, %v3200_v8 }
 0x2b8   : > { %v1235_v3 = vrot.slane %v4182_v22, 4 }
 0x2b9   : > { %1976 = vrot.lane.b32.xlu1 %v892_v16, %s5201_s10  ;;  %1980 = vrot.lane.b32.xlu2 %v906_v21, %s5202_s20  ;;  %v926_v16 = vperm.slane %v3732_v9, %v3200_v8  ;;  %v4168_v21 = vperm.slane %v1220_v56, %v3200_v8  ;;  %5265 = vst [vmem:[#allocation120_spill] sm:$0xff] %v4174_v1  ;;  %v1247_v62 = vrot.slane %v4174_v1, 4  ;;  %v4194_v10 = vpop.permute.xlu0 %1948 }
 0x2bb   : > { %v4154_v51 = vpop.permute.xlu1 %1808  ;;  %v4156_v55 = vpop.permute.xlu2 %1848  ;;  %2236 = vrot.lane.b32.xlu0 %v1212_v12, %s5206_s7  ;;  %v941_v9 = vrot.slane %v926_v16, 4 }
 0x2bc   : > { %5263 = vst [vmem:[#allocation118_spill] sm:$0xff] %v4154_v51 }
 0x2bd   : > { %v942_v56 = vsel %vm227_vm0, 0.0, %v941_v9  ;;  %v4207_v9 = vperm.slane %v3759_v41, %v3198_v7 }
 0x2c1   : > { %1988 = vrot.lane.b32.xlu1 %v908_v14, %s5206_s7  ;;  %1992 = vrot.lane.b32.xlu2 %v3719_v58, %s5209_s11  ;;  %v2559_v58 = vsel %vm2435_vm1, %v3406_v6, %v3920_v60  ;;  %v931_v14 = vrot.slane %v3752_v23, 4  ;;  %v1248_v6 = vsel %vm227_vm0, 0.0, %v1247_v62  ;;  %v943_v23 = vrot.slane %v3757_v35, 4 }
 0x2c2   : > { %v1253_v62 = vrot.slane %v3759_v41, 4 }
 0x2c3   : > { %v1821_v63 = vpop.permute.xlu1 %1820  ;;  %v4177_v12 = vpop.permute.xlu2 %1860  ;;  %2248 = vrot.lane.b32.xlu0 %v4168_v21, %s5154_s28 }
 0x2c4   : > { %v2560_v38 = vsel %vm2437_vm2, %v2559_v58, %v1821_v63  ;;  %v932_v63 = vsel %vm227_vm0, 0.0, %v931_v14  ;;  %v1236_v58 = vsel %vm227_vm0, 0.0, %v1235_v3  ;;  %v4230_v3 = vpop.permute.xlu0 %1960 }
 0x2c5   : > { %v2561_v51 = vsel %vm2439_vm3, %v2560_v38, %v1825_v28  ;;  %v944_v38 = vsel %vm227_vm0, 0.0, %v943_v23  ;;  %v940_v35 = vperm.slane %v932_v63, %v3200_v8 }
 0x2c9   : > { %2000 = vrot.lane.b32.xlu1 %v926_v16, %s5154_s28  ;;  %2004 = vrot.lane.b32.xlu2 %v942_v56, %s5157_s2  ;;  %v2562_v16 = vsel %vm2441_vm4, %v2561_v51, %v3941_v42  ;;  %v4219_v42 = vperm.slane %v1236_v58, %v3200_v8  ;;  %v4223_v51 = vperm.slane %v4207_v9, %v3200_v8 }
 0x2cb   : > { %v1833_v60 = vpop.permute.xlu1 %1832  ;;  %v4198_v1 = vpop.permute.xlu2 %1872  ;;  %2260 = vrot.lane.b32.xlu0 %v1248_v6, %s5162_s25  ;;  %v947_v6 = vrot.slane %v940_v35, 4  ;;  %v1283_v23 = vrot.slane %v4223_v51, 4 }
 0x2cc   : > { %v2563_v28 = vsel %vm2443_vm5, %v2562_v16, %v1833_v60 }
 0x2cd   : > { %v2564_v56 = vsel %vm5113_vm6, %v2563_v28, %v1837_v52  ;;  %v1254_v52 = vsel %vm227_vm0, 0.0, %v1253_v62  ;;  %v948_v28 = vsel %vm227_vm0, 0.0, %v947_v6 }
 0x2ce   : > { %v1262_v16 = vperm.slane %v1254_v52, %v3198_v7  ;;  %v4252_v52 = vpop.permute.xlu0 %1972 }
 0x2d0   : > { %v1273_v58 = vrot.slane %v1262_v16, 4 }
 0x2d1   : > { %2012 = vrot.lane.b32.xlu1 %v944_v38, %s5162_s25  ;;  %2016 = vrot.lane.b32.xlu2 %v3765_v47, %s5163_s24  ;;  %v2565_v47 = vsel %vm5112_vm7, %v2564_v56, %v3965_v36  ;;  %v1284_v36 = vsel %vm227_vm0, 0.0, %v1283_v23 }
 0x2d3   : > { %v1845_v41 = vpop.permute.xlu1 %1844  ;;  %v4225_v14 = vpop.permute.xlu2 %1884  ;;  %2272 = vrot.lane.b32.xlu0 %v4219_v42, %s5167_s18 }
 0x2d4   : > { %v2566_v60 = vsel %vm5111_vm8, %v2565_v47, %v1845_v41  ;;  %v4256_v47 = vperm.slane %v3785_v31, %v3198_v7 }
 0x2d5   : > { %v2567_v63 = vsel %vm5110_vm9, %v2566_v60, %v4156_v55  ;;  %v974_v60 = vperm.slane %v3815_v13, %v3200_v8 }
 0x2d6   : > { %v2568_v38 = vsel %vm5109_vm10, %v2567_v63, %v3987_v19  ;;  %v1274_v19 = vsel %vm227_vm0, 0.0, %v1273_v58  ;;  %v1301_v23 = vrot.slane %v4256_v47, 4 }
 0x2d9   : > { %2024 = vrot.lane.b32.xlu1 %v940_v35, %s5167_s18  ;;  %2028 = vrot.lane.b32.xlu2 %v948_v28, %s5170_s17  ;;  %v979_v35 = vrot.slane %v3797_v24, 4  ;;  %v4266_v24 = vperm.slane %v1262_v16, %v3200_v8  ;;  %v983_v16 = vrot.slane %v974_v60, 4 }
 0x2db   : > { %v1857_v62 = vpop.permute.xlu1 %1856  ;;  %v4245_v56 = vpop.permute.xlu2 %1896  ;;  %2284 = vrot.lane.b32.xlu0 %v1284_v36, %s5221_s6  ;;  %v980_v6 = vsel %vm227_vm0, 0.0, %v979_v35  ;;  %v984_v35 = vsel %vm227_vm0, 0.0, %v983_v16 }
 0x2dc   : > { %v2569_v55 = vsel %vm5108_vm11, %v2568_v38, %v1857_v62  ;;  %v1291_v62 = vrot.slane %v3785_v31, 4  ;;  %v1302_v38 = vsel %vm227_vm0, 0.0, %v1301_v23  ;;  %v985_v23 = vrot.slane %v3842_v5, 4 }
 0x2dd   : > { %v2570_v41 = vsel %vm5103_vm12, %v2569_v55, %v4177_v12  ;;  %v4269_v12 = vperm.slane %v1274_v19, %v3200_v8  ;;  %v4288_v55 = vpop.permute.xlu0 %1984  ;;  %vm5105_vm12 = vcmask 850944  }
 0x2de   : > { %v2571_v28 = vsel %vm5095_vm13, %v2570_v41, %v4016_v29  ;;  %v4286_v29 = vperm.slane %v3834_v4, %v3200_v8  ;;  %v4295_v41 = vperm.slane %v1302_v38, %v3200_v8  ;;  %v1292_v31 = vsel %vm227_vm0, 0.0, %v1291_v62 }
 0x2df   : > { %v1289_v58 = vrot.slane %v4269_v12, 4  ;;  %vm5097_vm13 = vcmask 588800  }
 0x2e0   : > { %v1323_v16 = vrot.slane %v4295_v41, 4 }
 0x2e1   : > { %2036 = vrot.lane.b32.xlu1 %v980_v6, %s5221_s6  ;;  %2040 = vrot.lane.b32.xlu2 %v3802_v37, %s5224_s19 }
 0x2e3   : > { %v1869_v63 = vpop.permute.xlu1 %1868  ;;  %v4274_v13 = vpop.permute.xlu2 %1908  ;;  %2296 = vrot.lane.b32.xlu0 %v4266_v24, %s5177_s26 }
 0x2e4   : > { %v2572_v37 = vsel %vm5093_vm14, %v2571_v28, %v1869_v63  ;;  %vm5098_vm14 = vcmask 523264   ;;  %v1017_v63 = vrot.slane %v4286_v29, 4 }
 0x2e5   : > { %v2573_v36 = vsel %vm5094_vm15, %v2572_v37, %v4198_v1  ;;  %v1290_v1 = vsel %vm227_vm0, 0.0, %v1289_v58  ;;  %vm5096_vm15 = vcmask 556032   ;;  %v4309_v37 = vperm.slane %v1292_v31, %v3198_v7  ;;  %v4318_v62 = vpop.permute.xlu0 %1996 }
 0x2e6   : > { %v2574_v4 = vsel %vm5098_vm14, %v2573_v36, %v4046_v50  ;;  %v986_v50 = vsel %vm227_vm0, 0.0, %v985_v23  ;;  %v1018_v36 = vsel %vm227_vm0, 0.0, %v1017_v63  ;;  %v1007_v58 = vrot.slane %v3858_v27, 4 }
 0x2e7   : > { %v1311_v5 = vrot.slane %v4309_v37, 4  ;;  %vm5099_vm14 = vcmask 687104   ;;  %v1019_v31 = vrot.slane %v3863_v20, 4  ;;  %v1329_v23 = vrot.slane %v3817_v40, 4 }
 0x2e9   : > { %2048 = vrot.lane.b32.xlu1 %v974_v60, %s5177_s26  ;;  %2052 = vrot.lane.b32.xlu2 %v984_v35, %s5227_s1  ;;  %v1020_v63 = vsel %vm227_vm0, 0.0, %v1019_v31 }
 0x2eb   : > { %v1881_v19 = vpop.permute.xlu1 %1880  ;;  %v4300_v6 = vpop.permute.xlu2 %1920  ;;  %2308 = vrot.lane.b32.xlu0 %v1290_v1, %s5200_s14 }
 0x2ec   : > { %v2575_v60 = vsel %vm5096_vm15, %v2574_v4, %v1881_v19  ;;  %vm5101_vm15 = vcmask 621568   ;;  %v1008_v4 = vsel %vm227_vm0, 0.0, %v1007_v58 }
 0x2ed   : > { %v2576_v28 = vsel %vm5097_vm13, %v2575_v60, %v4225_v14  ;;  %v1324_v14 = vsel %vm227_vm0, 0.0, %v1323_v16  ;;  %vm5100_vm13 = vcmask 654336   ;;  %v4333_v60 = vperm.slane %v3817_v40, %v3198_v7 }
 0x2ee   : > { %v2577_v35 = vsel %vm5101_vm15, %v2576_v28, %v4071_v34  ;;  %v1312_v34 = vsel %vm227_vm0, 0.0, %v1311_v5  ;;  %v1016_v28 = vperm.slane %v1008_v4, %v3200_v8  ;;  %vm5104_vm15 = vcmask 785408  }
 0x2ef   : > { %v4343_v20 = vperm.slane %v1312_v34, %v3200_v8 }
 0x2f0   : > { %v1023_v5 = vrot.slane %v1016_v28, 4 }
 0x2f1   : > { %2060 = vrot.lane.b32.xlu1 %v986_v50, %s5200_s14  ;;  %2064 = vrot.lane.b32.xlu2 %v1018_v36, %s5254_s3  ;;  %v4354_v36 = vpop.permute.xlu0 %2008 }
 0x2f3   : > { %v1893_v38 = vpop.permute.xlu1 %1892  ;;  %v4323_v1 = vpop.permute.xlu2 %1932  ;;  %2320 = vrot.lane.b32.xlu0 %v1324_v14, %s5187_s15 }
 0x2f4   : > { %v2578_v27 = vsel %vm5100_vm13, %v2577_v35, %v1893_v38  ;;  %vm2479_vm13 = vcmask 752640  }
 0x2f5   : > { %v2579_v19 = vsel %vm5099_vm14, %v2578_v27, %v4245_v56  ;;  %vm5102_vm14 = vcmask 719872   ;;  %v4347_v56 = vperm.slane %v4333_v60, %v3200_v8 }
 0x2f6   : > { %v2580_v40 = vsel %vm5102_vm14, %v2579_v19, %v4094_v53  ;;  %v1024_v53 = vsel %vm227_vm0, 0.0, %v1023_v5  ;;  %vm5107_vm14 = vcmask 818176  }
 0x2f7   : > { %v1359_v38 = vrot.slane %v4347_v56, 4 }
 0x2f9   : > { %2072 = vrot.lane.b32.xlu1 %v1020_v63, %s5187_s15  ;;  %2076 = vrot.lane.b32.xlu2 %v3871_v44, %s5161_s27  ;;  %v1330_v44 = vsel %vm227_vm0, 0.0, %v1329_v23  ;;  %v1360_v27 = vsel %vm227_vm0, 0.0, %v1359_v38  ;;  %v1055_v23 = vrot.slane %v3899_v2, 4  ;;  %v4398_v38 = vperm.slane %v3839_v59, %v3198_v7 }
 0x2fa   : > { %v1338_v35 = vperm.slane %v1330_v44, %v3198_v7 }
 0x2fb   : > { %v1905_v16 = vpop.permute.xlu1 %1904  ;;  %v1945_v50 = vpop.permute.xlu2 %1944  ;;  %2332 = vrot.lane.b32.xlu0 %v4343_v20, %s5193_s12 }
 0x2fc   : > { %v2581_v58 = vsel %vm2479_vm13, %v2580_v40, %v1905_v16  ;;  %v1349_v31 = vrot.slane %v1338_v35, 4  ;;  %v1056_v40 = vsel %vm227_vm0, 0.0, %v1055_v23  ;;  %v4382_v44 = vperm.slane %v1338_v35, %v3200_v8 }
 0x2fd   : > { %v2582_v14 = vsel %vm5104_vm15, %v2581_v58, %v4274_v13  ;;  %vm5106_vm15 = vcmask 883712  }
 0x2fe   : > { %v2583_v4 = vsel %vm5107_vm14, %v2582_v14, %v4121_v18  ;;  %v1350_v16 = vsel %vm227_vm0, 0.0, %v1349_v31  ;;  %v1050_v18 = vperm.slane %v3918_v39, %v3200_v8  ;;  %vm2493_vm14 = vcmask 982016  }
 0x2ff   : > { %v4385_v2 = vperm.slane %v1350_v16, %v3200_v8  ;;  %v1073_v31 = vrot.slane %v3936_v33, 4 }
 0x301   : > { %2084 = vrot.lane.b32.xlu1 %v1016_v28, %s5193_s12  ;;  %2088 = vrot.lane.b32.xlu2 %v1024_v53, %s5258_s9  ;;  %v4372_v28 = vpop.permute.xlu0 %2020  ;;  %v1365_v35 = vrot.slane %v4385_v2, 4  ;;  %v1074_v33 = vsel %vm227_vm0, 0.0, %v1073_v31 }
 0x303   : > { %v1917_v19 = vpop.permute.xlu1 %1916  ;;  %v1957_v13 = vpop.permute.xlu2 %1956  ;;  %2344 = vrot.lane.b32.xlu0 %v1360_v27, %s5197_s0 }
 0x304   : > { %v2584_v34 = vsel %vm5105_vm12, %v2583_v4, %v1917_v19  ;;  %vm2489_vm12 = vcmask 916480   ;;  %v1366_v19 = vsel %vm227_vm0, 0.0, %v1365_v35 }
 0x305   : > { %v2585_v63 = vsel %vm5106_vm15, %v2584_v34, %v4300_v6  ;;  %vm2491_vm15 = vcmask 949248  }
 0x306   : > { %v2586_v58 = vsel %vm2489_vm12, %v2585_v63, %v4145_v30  ;;  %v1367_v30 = vrot.slane %v3839_v59, 4  ;;  %v1061_v63 = vrot.slane %v3944_v61, 4 }
 0x308   : > { %v1368_v4 = vsel %vm227_vm0, 0.0, %v1367_v30 }
 0x309   : > { %2096 = vrot.lane.b32.xlu1 %v1056_v40, %s5197_s0  ;;  %2100 = vrot.lane.b32.xlu2 %v3905_v17, %s5201_s10  ;;  %v1059_v17 = vrot.slane %v1050_v18, 4  ;;  %v4402_v53 = vpop.permute.xlu0 %2032  ;;  %v4418_v40 = vperm.slane %v1368_v4, %v3198_v7 }
 0x30b   : > { %v1929_v6 = vpop.permute.xlu1 %1928  ;;  %v1969_v5 = vpop.permute.xlu2 %1968  ;;  %2356 = vrot.lane.b32.xlu0 %v4382_v44, %s5205_s8  ;;  %v1060_v27 = vsel %vm227_vm0, 0.0, %v1059_v17 }
 0x30c   : > { %v2587_v39 = vsel %vm2491_vm15, %v2586_v58, %v1929_v6  ;;  %v1062_v6 = vsel %vm227_vm0, 0.0, %v1061_v63  ;;  %v1082_v58 = vperm.slane %v1074_v33, %v3200_v8 }
 0x30d   : > { %v4394_v14 = vsel %vm2493_vm14, %v2587_v39, %v4323_v1  ;;  %v1377_v1 = vrot.slane %v4398_v38, 4 }
 0x311   : > { %2108 = vrot.lane.b32.xlu1 %v1050_v18, %s5205_s8  ;;  %2112 = vrot.lane.b32.xlu2 %v1060_v27, %s5206_s7  ;;  %v1378_v18 = vsel %vm227_vm0, 0.0, %v1377_v1  ;;  %v4429_v61 = vpop.permute.xlu0 %2044  ;;  %v1410_v1 = vperm.slane %v3865_v45, %v3198_v7 }
 0x313   : > { %v1941_v34 = vpop.permute.xlu1 %1940  ;;  %v1981_v23 = vpop.permute.xlu2 %1980  ;;  %2368 = vrot.lane.b32.xlu0 %v1366_v19, %s5210_s21  ;;  %v1415_v4 = vrot.slane %v1410_v1, 4 }
 0x314   : > { %v2590_v59 = vsel %vm2435_vm1, %v4069_v57, %v1941_v34  ;;  %v4427_v57 = vperm.slane %v1378_v18, %v3200_v8 }
 0x315   : > { %v2591_v16 = vsel %vm2437_vm2, %v2590_v59, %v1945_v50  ;;  %v4433_v50 = vperm.slane %v4418_v40, %v3200_v8 }
 0x316   : > { %v2592_v17 = vsel %vm2439_vm3, %v2591_v16, %v4194_v10  ;;  %v1097_v16 = vrot.slane %v3985_v11, 4 }
 0x317   : > { %v1401_v31 = vrot.slane %v4433_v50, 4 }
 0x319   : > { %2120 = vrot.lane.b32.xlu1 %v1062_v6, %s5210_s21  ;;  %2124 = vrot.lane.b32.xlu2 %v3949_v48, %s5154_s28  ;;  %v1095_v48 = vrot.slane %v1082_v58, 4  ;;  %v1402_v10 = vsel %vm227_vm0, 0.0, %v1401_v31  ;;  %v1405_v6 = vrot.slane %v3865_v45, 4 }
 0x31b   : > { %v1953_v39 = vpop.permute.xlu1 %1952  ;;  %v1993_v35 = vpop.permute.xlu2 %1992  ;;  %2380 = vrot.lane.b32.xlu0 %v4427_v57, %s5158_s30  ;;  %v1096_v19 = vsel %vm227_vm0, 0.0, %v1095_v48  ;;  %v1406_v45 = vsel %vm227_vm0, 0.0, %v1405_v6 }
 0x31c   : > { %v2593_v30 = vsel %vm2441_vm4, %v2592_v17, %v1953_v39  ;;  %v1116_v39 = vperm.slane %v4000_v0, %v3200_v8  ;;  %v4462_v17 = vperm.slane %v1410_v1, %v3200_v8 }
 0x31d   : > { %v2594_v27 = vsel %vm2443_vm5, %v2593_v30, %v1957_v13  ;;  %v4451_v13 = vpop.permute.xlu0 %2056 }
 0x31e   : > { %v2595_v59 = vsel %vm5113_vm6, %v2594_v27, %v4230_v3  ;;  %v1098_v3 = vsel %vm227_vm0, 0.0, %v1097_v16  ;;  %v1131_v27 = vrot.slane %v1116_v39, 4  ;;  %v1133_v16 = vrot.slane %v4030_v26, 4 }
 0x321   : > { %2132 = vrot.lane.b32.xlu1 %v1082_v58, %s5158_s30  ;;  %2136 = vrot.lane.b32.xlu2 %v1096_v19, %s5162_s25  ;;  %v1416_v58 = vsel %vm227_vm0, 0.0, %v1415_v4 }
 0x322   : > { %v4468_v11 = vperm.slane %v1416_v58, %v3200_v8 }
 0x323   : > { %v1965_v34 = vpop.permute.xlu1 %1964  ;;  %v2005_v63 = vpop.permute.xlu2 %2004  ;;  %2392 = vrot.lane.b32.xlu0 %v1402_v10, %s5166_s22  ;;  %v1132_v10 = vsel %vm227_vm0, 0.0, %v1131_v27 }
 0x324   : > { %v2596_v33 = vsel %vm5112_vm7, %v2595_v59, %v1965_v34  ;;  %v1437_v19 = vrot.slane %v4468_v11, 4 }
 0x325   : > { %v2597_v18 = vsel %vm5111_vm8, %v2596_v33, %v1969_v5  ;;  %v4480_v1 = vpop.permute.xlu0 %2068  ;;  %vm5274_vm8 = vcmask 654336  }
 0x326   : > { %v2598_v30 = vsel %vm5110_vm9, %v2597_v18, %v4252_v52  ;;  %v1121_v52 = vrot.slane %v4021_v49, 4  ;;  %v1438_v34 = vsel %vm227_vm0, 0.0, %v1437_v19  ;;  %vm5268_vm9 = vcmask 457728  }
 0x328   : > { %v1122_v18 = vsel %vm227_vm0, 0.0, %v1121_v52 }
 0x329   : > { %2144 = vrot.lane.b32.xlu1 %v1098_v3, %s5166_s22  ;;  %2148 = vrot.lane.b32.xlu2 %v3990_v54, %s5167_s18  ;;  %v4478_v54 = vperm.slane %v1406_v45, %v3198_v7  ;;  %v1130_v3 = vperm.slane %v1122_v18, %v3200_v8  ;;  %v1173_v18 = vrot.slane %v4092_v43, 4 }
 0x32b   : > { %v1977_v5 = vpop.permute.xlu1 %1976  ;;  %v2017_v0 = vpop.permute.xlu2 %2016  ;;  %2404 = vrot.lane.b32.xlu0 %v4462_v17, %s5171_s16  ;;  %v1425_v4 = vrot.slane %v4478_v54, 4 }
 0x32c   : > { %v2599_v48 = vsel %vm5109_vm10, %v2598_v30, %v1977_v5  ;;  %vm5267_vm10 = vcmask 424960  }
 0x32d   : > { %v2600_v31 = vsel %vm5108_vm11, %v2599_v48, %v1981_v23  ;;  %vm5266_vm11 = vcmask 392192   ;;  %v1426_v6 = vsel %vm227_vm0, 0.0, %v1425_v4  ;;  %v4497_v58 = vpop.permute.xlu0 %2080  ;;  %v1137_v48 = vrot.slane %v1130_v3, 4 }
 0x32e   : > { %v2601_v7 = vsel %vm5266_vm11, %v2600_v31, %v4288_v55  ;;  %v1149_v55 = vrot.slane %v4044_v15, 4  ;;  %v4506_v26 = vperm.slane %v1426_v6, %v3200_v8  ;;  %vm5271_vm11 = vcmask 556032  }
 0x330   : > { %v1150_v15 = vsel %vm227_vm0, 0.0, %v1149_v55 }
 0x331   : > { %2156 = vrot.lane.b32.xlu1 %v1116_v39, %s5171_s16  ;;  %2160 = vrot.lane.b32.xlu2 %v1132_v10, %s5221_s6  ;;  %v1134_v39 = vsel %vm227_vm0, 0.0, %v1133_v16  ;;  %v1158_v31 = vperm.slane %v1150_v15, %v3200_v8 }
 0x333   : > { %v1989_v23 = vpop.permute.xlu1 %1988  ;;  %v2029_v59 = vpop.permute.xlu2 %2028  ;;  %2416 = vrot.lane.b32.xlu0 %v1438_v34, %s5176_s5  ;;  %v1171_v34 = vrot.slane %v1158_v31, 4 }
 0x334   : > { %v2602_v33 = vsel %vm5267_vm10, %v2601_v7, %v1989_v23  ;;  %vm5270_vm10 = vcmask 523264  }
 0x335   : > { %v2603_v49 = vsel %vm5268_vm9, %v2602_v33, %v1993_v35  ;;  %vm5269_vm9 = vcmask 490496   ;;  %v1172_v23 = vsel %vm227_vm0, 0.0, %v1171_v34 }
 0x336   : > { %v2604_v45 = vsel %vm5269_vm9, %v2603_v49, %v4318_v62  ;;  %v4519_v62 = vpop.permute.xlu0 %2092  ;;  %vm5272_vm9 = vcmask 588800  }
 0x339   : > { %2168 = vrot.lane.b32.xlu1 %v1134_v39, %s5176_s5  ;;  %2172 = vrot.lane.b32.xlu2 %v4034_v25, %s5177_s26  ;;  %v1138_v25 = vsel %vm227_vm0, 0.0, %v1137_v48  ;;  %v1174_v39 = vsel %vm227_vm0, 0.0, %v1173_v18 }
 0x33b   : > { %v2001_v35 = vpop.permute.xlu1 %2000  ;;  %v2041_v5 = vpop.permute.xlu2 %2040  ;;  %2428 = vrot.lane.b32.xlu0 %v4506_v26, %s5181_s29 }
 0x33c   : > { %v2605_v30 = vsel %vm5270_vm10, %v2604_v45, %v2001_v35  ;;  %vm5273_vm10 = vcmask 621568  }
 0x33d   : > { %v2606_v27 = vsel %vm5271_vm11, %v2605_v30, %v2005_v63  ;;  %vm5275_vm11 = vcmask 687104   ;;  %v5280_v30 = vld [vmem:[#allocation114_spill] sm:$0xff] }
 0x33e   : > { %v2607_v10 = vsel %vm5272_vm9, %v2606_v27, %v4354_v36  ;;  %v4530_v49 = vpop.permute.xlu0 %2104  ;;  %vm5276_vm9 = vcmask 719872   ;;  %v1197_v48 = vrot.slane %v5280_v30, 4 }
 0x341   : > { %2180 = vrot.lane.b32.xlu1 %v1130_v3, %s5181_s29  ;;  %2184 = vrot.lane.b32.xlu2 %v1138_v25, %s5200_s14  ;;  %v5282_v25 = vld [vmem:[#allocation115_spill] sm:$0xff] }
 0x343   : > { %v2013_v19 = vpop.permute.xlu1 %2012  ;;  %v2053_v52 = vpop.permute.xlu2 %2052 }
 0x344   : > { %v2608_v4 = vsel %vm5273_vm10, %v2607_v10, %v2013_v19  ;;  %vm5278_vm10 = vcmask 818176   ;;  %v1198_v19 = vsel %vm227_vm0, 0.0, %v1197_v48 }
 0x345   : > { %v2609_v63 = vsel %vm5274_vm8, %v2608_v4, %v2017_v0  ;;  %v1192_v0 = vperm.slane %v4107_v32, %v3200_v8  ;;  %vm5277_vm8 = vcmask 785408   ;;  %v1206_v34 = vperm.slane %v1198_v19, %v3200_v8 }
 0x346   : > { %v2610_v33 = vsel %vm5275_vm11, %v2609_v63, %v4372_v28  ;;  %vm5279_vm11 = vcmask 850944   ;;  %v4545_v45 = vpop.permute.xlu0 %2116  ;;  %v5283_v63 = vld [vmem:[#allocation116_spill] sm:$0xff] }
 0x347   : > { %v1207_v43 = vrot.slane %v1192_v0, 4 }
 0x349   : > { %2192 = vrot.lane.b32.xlu1 %v1158_v31, %s5186_s13  ;;  %2196 = vrot.lane.b32.xlu2 %v1172_v23, %s5187_s15  ;;  %v1208_v32 = vsel %vm227_vm0, 0.0, %v1207_v43  ;;  %v1209_v31 = vrot.slane %v5282_v25, 4  ;;  %v5284_v43 = vld [vmem:[#allocation120_spill] sm:$0xff] }
 0x34b   : > { %v2025_v7 = vpop.permute.xlu1 %2024  ;;  %v2065_v16 = vpop.permute.xlu2 %2064  ;;  %v1210_v4 = vsel %vm227_vm0, 0.0, %v1209_v31  ;;  %v1251_v31 = vrot.slane %v4219_v42, 4 }
 0x34c   : > { %v2611_v36 = vsel %vm5276_vm9, %v2610_v33, %v2025_v7  ;;  %vm5281_vm9 = vcmask 883712   ;;  %v1213_v33 = vrot.slane %v1206_v34, 4 }
 0x34d   : > { %v2612_v6 = vsel %vm2479_vm13, %v2611_v36, %v2029_v59  ;;  %v2621_v36 = vsel %vm2435_vm1, %v4286_v29, %v2065_v16  ;;  %v1240_v16 = vperm.slane %v4182_v22, %v3200_v8  ;;  %v1263_v22 = vrot.slane %v4207_v9, 4 }
 0x34e   : > { %v2613_v3 = vsel %vm5277_vm8, %v2612_v6, %v4402_v53  ;;  %v4557_v10 = vpop.permute.xlu0 %2128  ;;  %vm5114_vm8 = vcmask 1014784   ;;  %v1214_v18 = vsel %vm227_vm0, 0.0, %v1213_v33  ;;  %v1252_v9 = vsel %vm227_vm0, 0.0, %v1251_v31 }
 0x351   : > { %2204 = vrot.lane.b32.xlu1 %v1174_v39, %s5190_s4  ;;  %2208 = vrot.lane.b32.xlu2 %v4097_v46, %s5193_s12 }
 0x353   : > { %v2037_v28 = vpop.permute.xlu1 %2036  ;;  %v2077_v55 = vpop.permute.xlu2 %2076 }
 0x354   : > { %v2614_v35 = vsel %vm5278_vm10, %v2613_v3, %v2037_v28  ;;  %v1245_v3 = vrot.slane %v4168_v21, 4  ;;  %vm5285_vm10 = vcmask 261120  }
 0x355   : > { %v2615_v59 = vsel %vm5279_vm11, %v2614_v35, %v2041_v5  ;;  %vm5286_vm11 = vcmask 293888  }
 0x356   : > { %v2616_v53 = vsel %vm5281_vm9, %v2615_v59, %v4429_v61  ;;  %v4574_v6 = vpop.permute.xlu0 %2140  ;;  %v1246_v29 = vsel %vm227_vm0, 0.0, %v1245_v3  ;;  %vm5287_vm9 = vcmask 326656  }
 0x359   : > { %2216 = vrot.lane.b32.xlu1 %v1192_v0, %s5196_s23  ;;  %2220 = vrot.lane.b32.xlu2 %v1208_v32, %s5197_s0  ;;  %s5485_s0 = sld [smem:[#allocation11_spill]] }
 0x35b   : > { %v2049_v46 = vpop.permute.xlu1 %2048  ;;  %v2089_v15 = vpop.permute.xlu2 %2088 }
 0x35c   : > { %v2617_v27 = vsel %vm2489_vm12, %v2616_v53, %v2049_v46 }
 0x35d   : > { %v2618_v5 = vsel %vm2491_vm15, %v2617_v27, %v2053_v52 }
 0x35e   : > { %v2619_v23 = vsel %vm2493_vm14, %v2618_v5, %v4451_v13  ;;  %v2622_v13 = vsel %vm2437_vm2, %v2621_v36, %v4480_v1  ;;  %v4589_v30 = vpop.permute.xlu0 %2152  ;;  %v1264_v5 = vsel %vm227_vm0, 0.0, %v1263_v22 }
 0x361   : > { %2228 = vrot.lane.b32.xlu1 %v1210_v4, %s5202_s20  ;;  %2232 = vrot.lane.b32.xlu2 %v5283_v63, %s5205_s8  ;;  %v1272_v4 = vperm.slane %v1264_v5, %v3200_v8 }
 0x363   : > { %v2061_v61 = vpop.permute.xlu1 %2060  ;;  %v2101_v7 = vpop.permute.xlu2 %2100 }
 0x364   : > { %v4567_v52 = vsel %vm5114_vm8, %v2619_v23, %v2061_v61  ;;  %v1285_v61 = vrot.slane %v1272_v4, 4 }
 0x366   : > { %v2165_v19 = vpop.permute.xlu0 %2164  ;;  %v1286_v33 = vsel %vm227_vm0, 0.0, %v1285_v61 }
 0x369   : > { %2240 = vrot.lane.b32.xlu1 %v1206_v34, %s5209_s11  ;;  %2244 = vrot.lane.b32.xlu2 %v1214_v18, %s5210_s21 }
 0x36b   : > { %v2073_v0 = vpop.permute.xlu1 %2072  ;;  %v2113_v39 = vpop.permute.xlu2 %2112 }
 0x36c   : > { %v2623_v28 = vsel %vm2439_vm3, %v2622_v13, %v2073_v0  ;;  %v1287_v0 = vrot.slane %v4266_v24, 4 }
 0x36d   : > { %v2624_v35 = vsel %vm2441_vm4, %v2623_v28, %v2077_v55  ;;  %v1249_v55 = vrot.slane %v1240_v16, 4 }
 0x36e   : > { %v2625_v1 = vsel %vm2443_vm5, %v2624_v35, %v4497_v58  ;;  %v1288_v28 = vsel %vm227_vm0, 0.0, %v1287_v0 }
 0x36f   : > { %v1250_v46 = vsel %vm227_vm0, 0.0, %v1249_v55 }
 0x371   : > { %2252 = vrot.lane.b32.xlu1 %v1246_v29, %s5157_s2  ;;  %2256 = vrot.lane.b32.xlu2 %v5284_v43, %s5158_s30 }
 0x373   : > { %v2085_v59 = vpop.permute.xlu1 %2084  ;;  %v2125_v32 = vpop.permute.xlu2 %2124 }
 0x374   : > { %v2626_v21 = vsel %vm5113_vm6, %v2625_v1, %v2085_v59  ;;  %vm5292_vm6 = vcmask 490496   ;;  %v1316_v59 = vperm.slane %v4309_v37, %v3200_v8  ;;  %v1339_v37 = vrot.slane %v4333_v60, 4 }
 0x375   : > { %v2627_v48 = vsel %vm5112_vm7, %v2626_v21, %v2089_v15  ;;  %vm5290_vm7 = vcmask 424960  }
 0x376   : > { %v2628_v58 = vsel %vm5285_vm10, %v2627_v48, %v4519_v62  ;;  %vm5288_vm10 = vcmask 359424   ;;  %v1325_v55 = vrot.slane %v1316_v59, 4 }
 0x379   : > { %2264 = vrot.lane.b32.xlu1 %v1240_v16, %s5163_s24  ;;  %2268 = vrot.lane.b32.xlu2 %v1250_v46, %s5166_s22  ;;  %v1326_v46 = vsel %vm227_vm0, 0.0, %v1325_v55 }
 0x37b   : > { %v2097_v53 = vpop.permute.xlu1 %2096  ;;  %v2137_v27 = vpop.permute.xlu2 %2136 }
 0x37c   : > { %v2629_v25 = vsel %vm5286_vm11, %v2628_v58, %v2097_v53  ;;  %vm5289_vm11 = vcmask 392192   ;;  %v1327_v58 = vrot.slane %v4343_v20, 4 }
 0x37d   : > { %v2630_v15 = vsel %vm5287_vm9, %v2629_v25, %v2101_v7  ;;  %v2177_v7 = vpop.permute.xlu0 %2176  ;;  %vm5291_vm9 = vcmask 457728  }
 0x37e   : > { %v2631_v34 = vsel %vm5288_vm10, %v2630_v15, %v4530_v49  ;;  %vm5293_vm10 = vcmask 523264   ;;  %v1328_v60 = vsel %vm227_vm0, 0.0, %v1327_v58 }
 0x381   : > { %2276 = vrot.lane.b32.xlu1 %v1252_v9, %s5170_s17  ;;  %2280 = vrot.lane.b32.xlu2 %v4223_v51, %s5171_s16 }
 0x383   : > { %v2109_v62 = vpop.permute.xlu1 %2108  ;;  %v2149_v63 = vpop.permute.xlu2 %2148 }
 0x384   : > { %v2632_v42 = vsel %vm5289_vm11, %v2631_v34, %v2109_v62  ;;  %vm5296_vm11 = vcmask 621568  }
 0x385   : > { %v2633_v23 = vsel %vm5290_vm7, %v2632_v42, %v2113_v39  ;;  %v4622_v39 = vperm.slane %v4256_v47, %v3200_v8  ;;  %v2189_v3 = vpop.permute.xlu0 %2188  ;;  %vm5294_vm7 = vcmask 556032  }
 0x386   : > { %v2634_v51 = vsel %vm5291_vm9, %v2633_v23, %v4545_v45  ;;  %vm5297_vm9 = vcmask 654336  }
 0x387   : > { %v1321_v16 = vrot.slane %v4622_v39, 4 }
 0x389   : > { %2288 = vrot.lane.b32.xlu1 %v1272_v4, %s5224_s19  ;;  %2292 = vrot.lane.b32.xlu2 %v1286_v33, %s5176_s5  ;;  %v1322_v43 = vsel %vm227_vm0, 0.0, %v1321_v16 }
 0x38b   : > { %v2121_v36 = vpop.permute.xlu1 %2120  ;;  %v2161_v18 = vpop.permute.xlu2 %2160 }
 0x38c   : > { %v2635_v49 = vsel %vm5292_vm6, %v2634_v51, %v2121_v36  ;;  %vm5295_vm6 = vcmask 588800   ;;  %v2725_v36 = vrot.slane %v4567_v52, 4 }
 0x38d   : > { %v2636_v13 = vsel %vm5293_vm10, %v2635_v49, %v2125_v32  ;;  %v2201_v32 = vpop.permute.xlu0 %2200  ;;  %vm5298_vm10 = vcmask 687104  }
 0x38e   : > { %v2637_v35 = vsel %vm5294_vm7, %v2636_v13, %v4557_v10  ;;  %vm5299_vm7 = vcmask 719872  }
 0x391   : > { %2300 = vrot.lane.b32.xlu1 %v1288_v28, %s5227_s1  ;;  %2304 = vrot.lane.b32.xlu2 %v4269_v12, %s5181_s29 }
 0x393   : > { %v2133_v45 = vpop.permute.xlu1 %2132  ;;  %v2173_v29 = vpop.permute.xlu2 %2172 }
 0x394   : > { %v2638_v24 = vsel %vm5295_vm6, %v2637_v35, %v2133_v45  ;;  %vm5300_vm6 = vcmask 785408  }
 0x395   : > { %v2639_v47 = vsel %vm5296_vm11, %v2638_v24, %v2137_v27  ;;  %v1340_v27 = vsel %vm227_vm0, 0.0, %v1339_v37  ;;  %vm5301_vm11 = vcmask 818176   ;;  %v2213_v31 = vpop.permute.xlu0 %2212  ;;  %v1387_v24 = vrot.slane %v4418_v40, 4 }
 0x396   : > { %v2640_v10 = vsel %vm5297_vm9, %v2639_v47, %v4574_v6  ;;  %v1348_v5 = vperm.slane %v1340_v27, %v3200_v8  ;;  %vm5302_vm9 = vcmask 850944  }
 0x398   : > { %v1361_v4 = vrot.slane %v1348_v5, 4 }
 0x399   : > { %2312 = vrot.lane.b32.xlu1 %v1322_v43, %s5254_s3  ;;  %2316 = vrot.lane.b32.xlu2 %v4295_v41, %s5186_s13 }
 0x39b   : > { %v2145_v12 = vpop.permute.xlu1 %2144  ;;  %v2185_v1 = vpop.permute.xlu2 %2184 }
 0x39c   : > { %v2641_v21 = vsel %vm5298_vm10, %v2640_v10, %v2145_v12  ;;  %vm5303_vm10 = vcmask 883712   ;;  %v1388_v10 = vsel %vm227_vm0, 0.0, %v1387_v24 }
 0x39d   : > { %v2642_v48 = vsel %vm5299_vm7, %v2641_v21, %v2149_v63  ;;  %v2225_v34 = vpop.permute.xlu0 %2224  ;;  %v1362_v63 = vsel %vm227_vm0, 0.0, %v1361_v4  ;;  %vm2735_vm7 = vcmask 1044484   ;;  %v1396_v40 = vperm.slane %v1388_v10, %v3200_v8 }
 0x39e   : > { %v2643_v22 = vsel %vm2479_vm13, %v2642_v48, %v4589_v30 }
 0x3a1   : > { %2324 = vrot.lane.b32.xlu1 %v1316_v59, %s5161_s27  ;;  %2328 = vrot.lane.b32.xlu2 %v1326_v46, %s5190_s4  ;;  %v1399_v59 = vrot.slane %v4427_v57, 4  ;;  %v1403_v57 = vrot.slane %v1396_v40, 4 }
 0x3a3   : > { %v2157_v41 = vpop.permute.xlu1 %2156  ;;  %v2197_v6 = vpop.permute.xlu2 %2196 }
 0x3a4   : > { %v2644_v53 = vsel %vm5300_vm6, %v2643_v22, %v2157_v41  ;;  %vm5305_vm6 = vcmask 195584   ;;  %v1404_v41 = vsel %vm227_vm0, 0.0, %v1403_v57 }
 0x3a5   : > { %v2645_v25 = vsel %vm5301_vm11, %v2644_v53, %v2161_v18  ;;  %v1382_v18 = vperm.slane %v4398_v38, %v3200_v8  ;;  %vm5306_vm11 = vcmask 228352   ;;  %v1435_v53 = vrot.slane %v4462_v17, 4 }
 0x3a6   : > { %v2646_v15 = vsel %vm5302_vm9, %v2645_v25, %v2165_v19  ;;  %v1363_v19 = vrot.slane %v4382_v44, 4  ;;  %v5304_v44 = vld [vmem:[#allocation106_spill] sm:$0xff]  ;;  %vm5307_vm9 = vcmask 261120  }
 0x3a7   : > { %v2652_v13 = vsel %vm2435_vm1, %v5304_v44, %v2189_v3  ;;  %v1397_v35 = vrot.slane %v1382_v18, 4 }
 0x3a8   : > { %v1364_v0 = vsel %vm227_vm0, 0.0, %v1363_v19 }
 0x3a9   : > { %2336 = vrot.lane.b32.xlu1 %v1328_v60, %s5258_s9  ;;  %2340 = vrot.lane.b32.xlu2 %v4347_v56, %s5196_s23  ;;  %v1430_v60 = vperm.slane %v4478_v54, %v3200_v8  ;;  %s5507_s9 = sld [smem:[#allocation122_spill]] }
 0x3ab   : > { %v2169_v30 = vpop.permute.xlu1 %2168  ;;  %v2209_v9 = vpop.permute.xlu2 %2208  ;;  %v1439_v17 = vrot.slane %v1430_v60, 4 }
 0x3ac   : > { %v2647_v20 = vsel %vm5303_vm10, %v2646_v15, %v2169_v30  ;;  %vm5308_vm10 = vcmask 293888  }
 0x3ad   : > { %v2648_v62 = vsel %vm2489_vm12, %v2647_v20, %v2173_v29  ;;  %v1398_v29 = vsel %vm227_vm0, 0.0, %v1397_v35  ;;  %v1440_v4 = vsel %vm227_vm0, 0.0, %v1439_v17 }
 0x3ae   : > { %v2649_v61 = vsel %vm2491_vm15, %v2648_v62, %v2177_v7  ;;  %v2237_v7 = vpop.permute.xlu0 %2236 }
 0x3b1   : > { %2348 = vrot.lane.b32.xlu1 %v1348_v5, %s5201_s10  ;;  %2352 = vrot.lane.b32.xlu2 %v1362_v63, %s5202_s20 }
 0x3b3   : > { %v2181_v42 = vpop.permute.xlu1 %2180  ;;  %v2221_v56 = vpop.permute.xlu2 %2220 }
 0x3b4   : > { %v2650_v23 = vsel %vm2493_vm14, %v2649_v61, %v2181_v42 }
 0x3b5   : > { %v2651_v33 = vsel %vm5114_vm8, %v2650_v23, %v2185_v1  ;;  %v1400_v1 = vsel %vm227_vm0, 0.0, %v1399_v59  ;;  %vm5320_vm8 = vcmask 687104   ;;  %v5326_v59 = vld [vmem:[#allocation49_spill] sm:$0xff] }
 0x3b6   : > { %v2726_v51 = vrot.slane %v2651_v33, 3  ;;  %v2249_v3 = vpop.permute.xlu0 %2248 }
 0x3b8   : > { %v4671_v49 = vsel %vm2735_vm7, %v2725_v36, %v2726_v51  ;;  %vm5309_vm7 = vcmask 326656  }
 0x3b9   : > { %2360 = vrot.lane.b32.xlu1 %v1364_v0, %s5206_s7  ;;  %2364 = vrot.lane.b32.xlu2 %v4385_v2, %s5209_s11 }
 0x3bb   : > { %v2193_v28 = vpop.permute.xlu1 %2192  ;;  %v2233_v45 = vpop.permute.xlu2 %2232 }
 0x3bc   : > { %v2653_v52 = vsel %vm2437_vm2, %v2652_v13, %v2193_v28 }
 0x3bd   : > { %v2654_v38 = vsel %vm2439_vm3, %v2653_v52, %v2197_v6 }
 0x3be   : > { %v2655_v16 = vsel %vm2441_vm4, %v2654_v38, %v2201_v32  ;;  %v2261_v37 = vpop.permute.xlu0 %2260 }
 0x3c1   : > { %2372 = vrot.lane.b32.xlu1 %v1382_v18, %s5154_s28  ;;  %2376 = vrot.lane.b32.xlu2 %v1398_v29, %s5157_s2 }
 0x3c3   : > { %v2205_v2 = vpop.permute.xlu1 %2204  ;;  %v2245_v47 = vpop.permute.xlu2 %2244 }
 0x3c4   : > { %v2656_v43 = vsel %vm2443_vm5, %v2655_v16, %v2205_v2 }
 0x3c5   : > { %v2657_v12 = vsel %vm5305_vm6, %v2656_v43, %v2209_v9  ;;  %vm5310_vm6 = vcmask 359424  }
 0x3c6   : > { %v2658_v21 = vsel %vm5306_vm11, %v2657_v12, %v2213_v31  ;;  %vm5311_vm11 = vcmask 392192   ;;  %v2273_v25 = vpop.permute.xlu0 %2272  ;;  %v1436_v31 = vsel %vm227_vm0, 0.0, %v1435_v53  ;;  %v5327_v12 = vld [vmem:[#allocation23_spill] sm:$0xff] }
 0x3c7   : > { %v2497_v10 = vsel %vm2435_vm1, %v5327_v12, %v5326_v59  ;;  %v5360_v12 = vld [vmem:[#allocation28_spill] sm:$0xff] }
 0x3c9   : > { %2384 = vrot.lane.b32.xlu1 %v1400_v1, %s5162_s25  ;;  %2388 = vrot.lane.b32.xlu2 %v4433_v50, %s5163_s24  ;;  %v5328_v1 = vld [vmem:[#allocation57_spill] sm:$0xff] }
 0x3cb   : > { %v2217_v32 = vpop.permute.xlu1 %2216  ;;  %v2257_v55 = vpop.permute.xlu2 %2256 }
 0x3cc   : > { %v2659_v48 = vsel %vm5307_vm9, %v2658_v21, %v2217_v32  ;;  %vm5312_vm9 = vcmask 424960   ;;  %v5329_v32 = vld [vmem:[#allocation51_spill] sm:$0xff] }
 0x3cd   : > { %v2660_v46 = vsel %vm5308_vm10, %v2659_v48, %v2221_v56  ;;  %vm5313_vm10 = vcmask 457728  }
 0x3ce   : > { %v2661_v6 = vsel %vm5309_vm7, %v2660_v46, %v2225_v34  ;;  %vm5314_vm7 = vcmask 490496   ;;  %v2285_v8 = vpop.permute.xlu0 %2284  ;;  %v1441_v34 = vrot.slane %v4506_v26, 4 }
 0x3d0   : > { %v1442_v42 = vsel %vm227_vm0, 0.0, %v1441_v34  ;;  %vm5323_vm0 = vcmask 818176  }
 0x3d1   : > { %2396 = vrot.lane.b32.xlu1 %v1396_v40, %s5167_s18  ;;  %2400 = vrot.lane.b32.xlu2 %v1404_v41, %s5170_s17  ;;  %v2498_v40 = vsel %vm2437_vm2, %v2497_v10, %v5328_v1  ;;  %v5361_v1 = vld [vmem:[#allocation86_spill] sm:$0xff] }
 0x3d2   : > { %v2499_v21 = vsel %vm2439_vm3, %v2498_v40, %v5329_v32 }
 0x3d3   : > { %v2229_v22 = vpop.permute.xlu1 %2228  ;;  %v2269_v27 = vpop.permute.xlu2 %2268 }
 0x3d4   : > { %v2662_v50 = vsel %vm5310_vm6, %v2661_v6, %v2229_v22  ;;  %vm5315_vm6 = vcmask 523264  }
 0x3d5   : > { %v2663_v58 = vsel %vm5311_vm11, %v2662_v50, %v2233_v45  ;;  %vm5316_vm11 = vcmask 556032   ;;  %v5332_v50 = vld [vmem:[#allocation53_spill] sm:$0xff] }
 0x3d6   : > { %v2664_v30 = vsel %vm5312_vm9, %v2663_v58, %v2237_v7  ;;  %vm5317_vm9 = vcmask 588800   ;;  %v2297_v19 = vpop.permute.xlu0 %2296 }
 0x3d9   : > { %2408 = vrot.lane.b32.xlu1 %v1436_v31, %s5221_s6  ;;  %2412 = vrot.lane.b32.xlu2 %v4468_v11, %s5224_s19  ;;  %s5506_s6 = sld [smem:[#allocation18_spill]] }
 0x3db   : > { %v2241_v5 = vpop.permute.xlu1 %2240  ;;  %v2281_v20 = vpop.permute.xlu2 %2280 }
 0x3dc   : > { %v2665_v15 = vsel %vm5313_vm10, %v2664_v30, %v2241_v5  ;;  %vm5318_vm10 = vcmask 621568   ;;  %v5336_v5 = vld [vmem:[#allocation80_spill] sm:$0xff]  ;;  %v5337_v30 = vld [vmem:[#allocation54_spill] sm:$0xff] }
 0x3dd   : > { %v2666_v9 = vsel %vm5314_vm7, %v2665_v15, %v2245_v47  ;;  %vm5319_vm7 = vcmask 654336   ;;  %v2528_v15 = vsel %vm2435_vm1, %v5337_v30, %v5336_v5  ;;  %v5375_v30 = vld [vmem:[#allocation96_spill] sm:$0xff] }
 0x3de   : > { %v2667_v62 = vsel %vm5315_vm6, %v2666_v9, %v2249_v3  ;;  %vm5321_vm6 = vcmask 719872   ;;  %v4729_v44 = vpop.permute.xlu0 %2308  ;;  %v5338_v9 = vld [vmem:[#allocation56_spill] sm:$0xff] }
 0x3df   : > { %s5511_s11 = sshll.u32 %s5506_s6, 3  ;;  %s2746_s4 = scalar_lea.sflag [#allocation4], %s5506_s6 }
 0x3e0   : > { %s152_s19 = scalar_lea.vmem [#allocation5], %s5511_s11 }
 0x3e1   : > { %2420 = vrot.lane.b32.xlu1 %v1430_v60, %s5177_s26  ;;  %2424 = vrot.lane.b32.xlu2 %v1440_v4, %s5227_s1  ;;  %s2857_s1 = sshll.u32 %s5485_s0, 3  ;;  %s2760_s20 = sshll.u32 %s152_s19, 4  ;;  %s2761_s20 = int_to_ptr.vmem [resolvable:$true] %s2760_s20 }
 0x3e2   : > { %s2758_s10 = scalar_lea.hbm %s5507_s9, %s2857_s1 }
 0x3e3   : > { %v2253_v54 = vpop.permute.xlu1 %2252  ;;  %v2293_v61 = vpop.permute.xlu2 %2292  ;;  %s2762_s21 = sshll.u32 %s2758_s10, 4  ;;  %s2763_s21 = int_to_ptr.hbm [resolvable:$true] %s2762_s21 }
 0x3e4   : > { %v2668_v11 = vsel %vm5316_vm11, %v2667_v62, %v2253_v54  ;;  %vm5322_vm11 = vcmask 785408   ;;  %v5341_v62 = vld [vmem:[#allocation24_spill] sm:$0xff]  ;;  %s3001_s13 = sshra.s32 %s2763_s21, 4  ;;  %s3002_s13 = int_to_ptr.hbm [resolvable:$true] %s3001_s13 }
 0x3e5   : > { %v2669_v63 = vsel %vm5317_vm9, %v2668_v11, %v2257_v55  ;;  %vm5324_vm9 = vcmask 850944   ;;  %v5330_v55 = vld [vmem:[#allocation89_spill] sm:$0xff]  ;;  %v5342_v11 = vld [vmem:[#allocation19_spill] sm:$0xff]  ;;  %s3003_s15 = scalar_lea.hbm %s3002_s13, 8 }
 0x3e6   : > { %v2670_v23 = vsel %vm5318_vm10, %v2669_v63, %v2261_v37  ;;  %vm5325_vm10 = vcmask 883712   ;;  %v2321_v38 = vpop.permute.xlu0 %2320  ;;  %v2500_v48 = vsel %vm2441_vm4, %v2499_v21, %v5330_v55  ;;  %v5331_v37 = vld [vmem:[#allocation59_spill] sm:$0xff]  ;;  %v2436_v34 = vsel %vm2435_vm1, %v5342_v11, %v5341_v62  ;;  %v5363_v21 = vld [vmem:[#allocation60_spill] sm:$0xff]  ;;  %p3004_p4 = scmp.ne.s32.totalorder %s3002_s13, %s3003_s15 }
 0x3e7   : > { %v2501_v41 = vsel %vm2443_vm5, %v2500_v48, %v5331_v37  ;;  %v5343_v63 = vld [vmem:[#allocation63_spill] sm:$0xff]  ;;  %v5365_v48 = vld [vmem:[#allocation94_spill] sm:$0xff] }
 0x3e8   : > { %v5383_v11 = vld [vmem:[#allocation91_spill] sm:$0xff]  ;;  %p3005_p5 = pnand %p3004_p4, %p3165_p9 }
 0x3e9   : > { %2432 = vrot.lane.b32.xlu1 %v1442_v42, %s5200_s14  ;;  %s5508_s14 = smov %s5507_s9 }
 0x3ea   : > { %p3006_p6 = pneg %p3005_p5  ;;  %s3007_s18 = scalar_lea.hbm %s5508_s14, 16 }
 0x3eb   : > { %v2265_v56 = vpop.permute.xlu1 %2264  ;;  %v2305_v51 = vpop.permute.xlu2 %2304  ;;  %p3008_p7 = scmp.lt.s32.totalorder %s3002_s13, %s5508_s14  ;;  %p3009_p8 = scmp.lt.s32.totalorder %s3007_s18, %s3003_s15 }
 0x3ec   : > { %v2671_v33 = vsel %vm5319_vm7, %v2670_v23, %v2265_v56  ;;  %vm5335_vm7 = vcmask 228352  }
 0x3ed   : > { %v2672_v36 = vsel %vm5320_vm8, %v2671_v33, %v2269_v27  ;;  %vm5333_vm8 = vcmask 195584   ;;  %v5334_v27 = vld [vmem:[#allocation61_spill] sm:$0xff]  ;;  %p3010_p10 = por %p3009_p8, %p3008_p7 }
 0x3ee   : > { %v2673_v0 = vsel %vm5321_vm6, %v2672_v36, %v2273_v25  ;;  %v2333_v3 = vpop.permute.xlu0 %2332  ;;  %v2502_v53 = vsel %vm5333_vm8, %v2501_v41, %v5332_v50  ;;  %vm5339_vm6 = vcmask 261120   ;;  %v5347_v36 = vld [vmem:[#allocation90_spill] sm:$0xff] }
 0x3ef   : > { %v2503_v25 = vsel %vm5335_vm7, %v2502_v53, %v5334_v27  ;;  %v5366_v41 = vld [vmem:[#allocation22_spill] sm:$0xff]  ;;  %v5371_v27 = vld [vmem:[#allocation67_spill] sm:$0xff]  ;;  %p3011_p13 = pnand %p3010_p10, %p3006_p6 }
 0x3f0   : > { %v5369_v53 = vld [vmem:[#allocation30_spill] sm:$0xff] }
 0x3f3   : > { %v2277_v18 = vpop.permute.xlu1 %2276  ;;  %v2317_v52 = vpop.permute.xlu2 %2316 }
 0x3f4   : > { %v2674_v26 = vsel %vm2479_vm13, %v2673_v0, %v2277_v18  ;;  %v5348_v18 = vld [vmem:[#allocation58_spill] sm:$0xff] }
 0x3f5   : > { %v2675_v7 = vsel %vm5322_vm11, %v2674_v26, %v2281_v20  ;;  %v2504_v20 = vsel %vm5339_vm6, %v2503_v25, %v5338_v9  ;;  %vm5344_vm11 = vcmask 293888  }
 0x3f6   : > { %v2676_v28 = vsel %vm5323_vm0, %v2675_v7, %v2285_v8  ;;  %v2345_v22 = vpop.permute.xlu0 %2344  ;;  %v2505_v42 = vsel %vm5344_vm11, %v2504_v20, %v5343_v63  ;;  %vm5349_vm0 = vcmask 326656   ;;  %v5379_v20 = vld [vmem:[#allocation62_spill] sm:$0xff] }
 0x3f7   : > { %v2506_v0 = vsel %vm5349_vm0, %v2505_v42, %v5348_v18  ;;  %v5385_v63 = vld [vmem:[#allocation98_spill] sm:$0xff] }
 0x3f8   : > { %v5393_v18 = vld [vmem:[#allocation34_spill] sm:$0xff] }
 0x3fb   : > { %v2289_v13 = vpop.permute.xlu1 %2288  ;;  %v2329_v47 = vpop.permute.xlu2 %2328 }
 0x3fc   : > { %v2677_v45 = vsel %vm5324_vm9, %v2676_v28, %v2289_v13  ;;  %vm5350_vm9 = vmmov %vm5333_vm8  ;;  %v5351_v13 = vld [vmem:[#allocation21_spill] sm:$0xff] }
 0x3fd   : > { %v2678_v35 = vsel %vm5325_vm10, %v2677_v45, %v2293_v61  ;;  %v5345_v61 = vld [vmem:[#allocation82_spill] sm:$0xff]  ;;  %v5352_v45 = vld [vmem:[#allocation84_spill] sm:$0xff]  ;;  %vm5355_vm10 = vmmov %vm5333_vm8 }
 0x3fe   : > { %v2679_v24 = vsel %vm2489_vm12, %v2678_v35, %v2297_v19  ;;  %v2357_v54 = vpop.permute.xlu0 %2356  ;;  %v5346_v19 = vld [vmem:[#allocation26_spill] sm:$0xff]  ;;  %vm5359_vm8 = vmmov %vm5339_vm6 }
 0x3ff   : > { %v2438_v33 = vsel %vm2437_vm2, %v2436_v34, %v5346_v19  ;;  %vm5367_vm0 = vmmov %vm5350_vm9 }
 0x400   : > { %v2440_v28 = vsel %vm2439_vm3, %v2438_v33, %v5351_v13  ;;  %v5391_v33 = vld [vmem:[#allocation27_spill] sm:$0xff]  ;;  %v5397_v13 = vld [vmem:[#allocation64_spill] sm:$0xff] }
 0x403   : > { %v2301_v29 = vpop.permute.xlu1 %2300  ;;  %v2341_v57 = vpop.permute.xlu2 %2340 }
 0x404   : > { %v2680_v2 = vsel %vm2491_vm15, %v2679_v24, %v2301_v29 }
 0x405   : > { %v4737_v16 = vsel %vm2493_vm14, %v2680_v2, %v2305_v51  ;;  %v5356_v2 = vld [vmem:[#allocation65_spill] sm:$0xff] }
 0x406   : > { %v2369_v32 = vpop.permute.xlu0 %2368 }
 0x40b   : > { %v2313_v43 = vpop.permute.xlu1 %2312  ;;  %v2353_v31 = vpop.permute.xlu2 %2352 }
 0x40c   : > { %v2683_v6 = vsel %vm2435_vm1, %v4622_v39, %v2313_v43  ;;  %v5340_v39 = vld [vmem:[#allocation87_spill] sm:$0xff]  ;;  %vm5353_vm1 = vmmov %vm5335_vm7  ;;  %v5358_v43 = vld [vmem:[#allocation20_spill] sm:$0xff]  ;;  %vm5364_vm7 = vcmask 392192  }
 0x40d   : > { %v2684_v58 = vsel %vm2437_vm2, %v2683_v6, %v2317_v52  ;;  %v2529_v4 = vsel %vm2437_vm2, %v2528_v15, %v5340_v39  ;;  %vm5357_vm2 = vcmask 359424   ;;  %v2442_v59 = vsel %vm2441_vm4, %v2440_v28, %v5358_v43 }
 0x40e   : > { %v2685_v17 = vsel %vm2439_vm3, %v2684_v58, %v2321_v38  ;;  %v2530_v56 = vsel %vm2439_vm3, %v2529_v4, %v5345_v61  ;;  %v5354_v38 = vld [vmem:[#allocation92_spill] sm:$0xff]  ;;  %v2444_v10 = vsel %vm2443_vm5, %v2442_v59, %v5360_v12  ;;  %vm5362_vm3 = vmmov %vm5353_vm1  ;;  %v5407_v59 = vld [vmem:[#allocation95_spill] sm:$0xff] }
 0x40f   : > { %v2531_v51 = vsel %vm2441_vm4, %v2530_v56, %v5347_v36  ;;  %v2446_v6 = vsel %vm5367_vm0, %v2444_v10, %v5366_v41  ;;  %v5388_v56 = vld [vmem:[#allocation69_spill] sm:$0xff]  ;;  %v5410_v10 = vld [vmem:[#allocation102_spill] sm:$0xff] }
 0x410   : > { %v2532_v52 = vsel %vm2443_vm5, %v2531_v51, %v5352_v45  ;;  %v5417_v41 = vld [vmem:[#allocation38_spill] sm:$0xff] }
 0x411   : > { %v2533_v29 = vsel %vm5355_vm10, %v2532_v52, %v5354_v38 }
 0x412   : > { %v2534_v40 = vsel %vm5362_vm3, %v2533_v29, %v5361_v1  ;;  %vm5380_vm3 = vcmask 457728   ;;  %v5403_v29 = vld [vmem:[#allocation36_spill] sm:$0xff] }
 0x413   : > { %v2325_v46 = vpop.permute.xlu1 %2324  ;;  %v2365_v24 = vpop.permute.xlu2 %2364 }
 0x414   : > { %v2686_v8 = vsel %vm2441_vm4, %v2685_v17, %v2325_v46  ;;  %v2535_v46 = vsel %vm5339_vm6, %v2534_v40, %v5365_v48  ;;  %vm5368_vm4 = vcmask 326656   ;;  %v5377_v17 = vld [vmem:[#allocation25_spill] sm:$0xff]  ;;  %v5415_v48 = vld [vmem:[#allocation66_spill] sm:$0xff] }
 0x415   : > { %v2687_v23 = vsel %vm2443_vm5, %v2686_v8, %v2329_v47  ;;  %v2507_v47 = vsel %vm5357_vm2, %v2506_v0, %v5356_v2  ;;  %vm5370_vm5 = vmmov %vm5353_vm1  ;;  %v5381_v8 = vld [vmem:[#allocation32_spill] sm:$0xff] }
 0x416   : > { %v2688_v26 = vsel %vm5350_vm9, %v2687_v23, %v2333_v3  ;;  %v2508_v55 = vsel %vm5364_vm7, %v2507_v47, %v5363_v21  ;;  %v2448_v58 = vsel %vm5370_vm5, %v2446_v6, %v5369_v53  ;;  %vm5372_vm9 = vcmask 424960   ;;  %vm5376_vm10 = vmmov %vm5368_vm4  ;;  %v2381_v23 = vpop.permute.xlu0 %2380  ;;  %v5405_v47 = vld [vmem:[#allocation71_spill] sm:$0xff] }
 0x417   : > { %v2509_v25 = vsel %vm5372_vm9, %v2508_v55, %v5371_v27  ;;  %vm5390_vm5 = vmmov %vm5372_vm9  ;;  %v5413_v21 = vld [vmem:[#allocation31_spill] sm:$0xff] }
 0x418   : > { %v2510_v39 = vsel %vm5380_vm3, %v2509_v25, %v5379_v20  ;;  %vm5392_vm9 = vmmov %vm5376_vm10  ;;  %v5424_v25 = vld [vmem:[#allocation73_spill] sm:$0xff] }
 0x41b   : > { %v2337_v60 = vpop.permute.xlu1 %2336  ;;  %v2377_v4 = vpop.permute.xlu2 %2376 }
 0x41c   : > { %v2689_v35 = vsel %vm5353_vm1, %v2688_v26, %v2337_v60  ;;  %v5373_v60 = vld [vmem:[#allocation88_spill] sm:$0xff]  ;;  %vm5374_vm1 = vmmov %vm5344_vm11  ;;  %v5395_v26 = vld [vmem:[#allocation93_spill] sm:$0xff] }
 0x41d   : > { %v2690_v3 = vsel %vm5359_vm8, %v2689_v35, %v2341_v57  ;;  %v2536_v5 = vsel %vm5374_vm1, %v2535_v46, %v5373_v60  ;;  %vm5378_vm8 = vmmov %vm5339_vm6  ;;  %v5401_v35 = vld [vmem:[#allocation29_spill] sm:$0xff] }
 0x41e   : > { %v2691_v37 = vsel %vm5344_vm11, %v2690_v3, %v2345_v22  ;;  %v2537_v15 = vsel %vm5376_vm10, %v2536_v5, %v5375_v30  ;;  %v2450_v9 = vsel %vm5378_vm8, %v2448_v58, %v5377_v17  ;;  %vm5382_vm7 = vmmov %vm5374_vm1  ;;  %vm5386_vm11 = vcmask 392192   ;;  %v5422_v58 = vld [vmem:[#allocation104_spill] sm:$0xff]  ;;  %v5426_v5 = vld [vmem:[#allocation33_spill] sm:$0xff] }
 0x41f   : > { %v2452_v62 = vsel %vm5382_vm7, %v2450_v9, %v5381_v8  ;;  %vm5384_vm6 = vmmov %vm5357_vm2  ;;  %v5431_v9 = vld [vmem:[#allocation99_spill] sm:$0xff] }
 0x420   : > { %v2538_v34 = vsel %vm5384_vm6, %v2537_v15, %v5383_v11  ;;  %vm5387_vm0 = vmmov %vm5386_vm11  ;;  %v2454_v36 = vsel %vm5392_vm9, %v2452_v62, %v5391_v33  ;;  %v5436_v62 = vld [vmem:[#allocation107_spill] sm:$0xff] }
 0x421   : > { %v2539_v42 = vsel %vm5386_vm11, %v2538_v34, %v5385_v63  ;;  %vm5394_vm1 = vmmov %vm5357_vm2  ;;  %vm5406_vm11 = vcmask 556032   ;;  %v5438_v34 = vld [vmem:[#allocation35_spill] sm:$0xff] }
 0x422   : > { %v2456_v0 = vsel %vm5394_vm1, %v2454_v36, %v5393_v18  ;;  %vm5396_vm10 = vmmov %vm5390_vm5  ;;  %v5445_v36 = vld [vmem:[#allocation101_spill] sm:$0xff] }
 0x423   : > { %v2349_v7 = vpop.permute.xlu1 %2348  ;;  %vm5400_vm8 = vmmov %vm5380_vm3  ;;  %v2389_v40 = vpop.permute.xlu2 %2388  ;;  %v5447_v18 = vld [vmem:[#allocation109_spill] sm:$0xff] }
 0x424   : > { %v2692_v57 = vsel %vm5368_vm4, %v2691_v37, %v2349_v7  ;;  %vm5389_vm4 = vcmask 490496   ;;  %v2540_v7 = vsel %vm5396_vm10, %v2539_v42, %v5395_v26  ;;  %vm5402_vm7 = vmmov %vm5387_vm0  ;;  %vm5416_vm10 = vcmask 588800  }
 0x425   : > { %v2693_v22 = vsel %vm5357_vm2, %v2692_v57, %v2353_v31  ;;  %v2511_v31 = vsel %vm5389_vm4, %v2510_v39, %v5388_v56  ;;  %vm5398_vm2 = vcmask 523264   ;;  %v2458_v38 = vsel %vm5402_vm7, %v2456_v0, %v5401_v35  ;;  %vm5404_vm6 = vmmov %vm5390_vm5  ;;  %v5419_v57 = vld [vmem:[#allocation97_spill] sm:$0xff]  ;;  %v5455_v35 = vld [vmem:[#allocation44_spill] sm:$0xff] }
 0x426   : > { %v2694_v61 = vsel %vm5387_vm0, %v2693_v22, %v2357_v54  ;;  %v2512_v28 = vsel %vm5398_vm2, %v2511_v31, %v5397_v13  ;;  %v5399_v54 = vld [vmem:[#allocation100_spill] sm:$0xff]  ;;  %v2460_v2 = vsel %vm5404_vm6, %v2458_v38, %v5403_v29  ;;  %vm5408_vm0 = vmmov %vm5389_vm4  ;;  %vm5425_vm6 = vcmask 621568   ;;  %v5441_v31 = vld [vmem:[#allocation42_spill] sm:$0xff] }
 0x427   : > { %v2541_v45 = vsel %vm5400_vm8, %v2540_v7, %v5399_v54  ;;  %v2513_v43 = vsel %vm5406_vm11, %v2512_v28, %v5405_v47  ;;  %vm5409_vm4 = vmmov %vm5408_vm0  ;;  %v5429_v22 = vld [vmem:[#allocation40_spill] sm:$0xff]  ;;  %v5450_v13 = vld [vmem:[#allocation37_spill] sm:$0xff] }
 0x428   : > { %v2542_v3 = vsel %vm5408_vm0, %v2541_v45, %v5407_v59  ;;  %vm5412_vm9 = vmmov %vm5398_vm2  ;;  %v2514_v46 = vsel %vm5416_vm10, %v2513_v43, %v5415_v48  ;;  %v5452_v54 = vld [vmem:[#allocation70_spill] sm:$0xff]  ;;  %v5457_v29 = vld [vmem:[#allocation77_spill] sm:$0xff] }
 0x429   : > { %vm5414_vm1 = vmmov %vm5380_vm3  ;;  %v2515_v60 = vsel %vm5425_vm6, %v2514_v46, %v5424_v25  ;;  %v5458_v47 = vld [vmem:[#allocation103_spill] sm:$0xff] }
 0x42a   : > { %v2462_v55 = vsel %vm5414_vm1, %v2460_v2, %v5413_v21  ;;  %vm5420_vm8 = vmmov %vm5406_vm11  ;;  %vm5435_vm1 = vcmask 654336   ;;  %v5459_v59 = vld [vmem:[#allocation111_spill] sm:$0xff] }
 0x42b   : > { %v2361_v50 = vpop.permute.xlu1 %2360  ;;  %vm5423_vm7 = vmmov %vm5416_vm10  ;;  %v2401_v42 = vpop.permute.xlu2 %2400  ;;  %v5466_v46 = vld [vmem:[#allocation79_spill] sm:$0xff] }
 0x42c   : > { %v2695_v19 = vsel %vm5390_vm5, %v2694_v61, %v2361_v50  ;;  %vm5411_vm5 = vmmov %vm5398_vm2 }
 0x42d   : > { %v2696_v52 = vsel %vm5380_vm3, %v2695_v19, %v2365_v24  ;;  %v2543_v1 = vsel %vm5411_vm5, %v2542_v3, %v5410_v10  ;;  %vm5418_vm2 = vmmov %vm5408_vm0  ;;  %v5443_v19 = vld [vmem:[#allocation75_spill] sm:$0xff] }
 0x42e   : > { %v2697_v12 = vsel %vm5409_vm4, %v2696_v52, %v2369_v32  ;;  %v2464_v6 = vsel %vm5418_vm2, %v2462_v55, %v5417_v41  ;;  %v2544_v50 = vsel %vm5420_vm8, %v2543_v1, %v5419_v57  ;;  %v2393_v32 = vpop.permute.xlu0 %2392  ;;  %vm5421_vm3 = vmmov %vm5420_vm8  ;;  %v5461_v10 = vld [vmem:[#allocation39_spill] sm:$0xff]  ;;  %v5465_v55 = vld [vmem:[#allocation46_spill] sm:$0xff] }
 0x42f   : > { %v2545_v27 = vsel %vm5423_vm7, %v2544_v50, %v5422_v58  ;;  %vm5427_vm11 = vmmov %vm5411_vm5  ;;  %v5468_v41 = vld [vmem:[#allocation105_spill] sm:$0xff] }
 0x430   : > { %v2466_v30 = vsel %vm5427_vm11, %v2464_v6, %v5426_v5  ;;  %vm5428_vm0 = vmmov %vm5423_vm7  ;;  %vm5444_vm7 = vcmask 687104   ;;  %vm5448_vm11 = vcmask 719872   ;;  %v5470_v57 = vld [vmem:[#allocation113_spill] sm:$0xff] }
 0x431   : > { %vm5430_vm4 = vmmov %vm5421_vm3 }
 0x432   : > { %v2468_v17 = vsel %vm5430_vm4, %v2466_v30, %v5429_v22  ;;  %vm5432_vm5 = vmmov %vm5425_vm6  ;;  %v5478_v30 = vld [vmem:[#allocation48_spill] sm:$0xff]  ;;  %v5480_v22 = vld [vmem:[#allocation81_spill] sm:$0xff] }
 0x433   : > { %v2373_v51 = vpop.permute.xlu1 %2372  ;;  %v2546_v20 = vsel %vm5432_vm5, %v2545_v27, %v5431_v9  ;;  %vm5437_vm10 = vmmov %vm5435_vm1  ;;  %v5474_v27 = vld [vmem:[#allocation41_spill] sm:$0xff]  ;;  %v5482_v9 = vld [vmem:[#allocation108_spill] sm:$0xff] }
 0x434   : > { %v2698_v24 = vsel %vm5412_vm9, %v2697_v12, %v2373_v51  ;;  %vm5433_vm9 = vmmov %vm5432_vm5  ;;  %v2547_v11 = vsel %vm5437_vm10, %v2546_v20, %v5436_v62  ;;  %vm5460_vm10 = vcmask 785408  }
 0x435   : > { %v2699_v53 = vsel %vm5421_vm3, %v2698_v24, %v2377_v4  ;;  %v5434_v4 = vld [vmem:[#allocation68_spill] sm:$0xff]  ;;  %vm5439_vm2 = vmmov %vm5428_vm0 }
 0x436   : > { %v2700_v15 = vsel %vm5428_vm0, %v2699_v53, %v2381_v23  ;;  %v2516_v8 = vsel %vm5435_vm1, %v2515_v60, %v5434_v4  ;;  %v2470_v63 = vsel %vm5439_vm2, %v2468_v17, %v5438_v34  ;;  %vm5440_vm8 = vmmov %vm5435_vm1  ;;  %v2405_v26 = vpop.permute.xlu0 %2404  ;;  %v5476_v60 = vld [vmem:[#allocation74_spill] sm:$0xff]  ;;  %v5484_v4 = vld [vmem:[#allocation117_spill] sm:$0xff] }
 0x437   : > { %vm5442_vm3 = vmmov %vm5432_vm5  ;;  %v2517_v33 = vsel %vm5444_vm7, %v2516_v8, %v5443_v19 }
 0x438   : > { %v2472_v23 = vsel %vm5442_vm3, %v2470_v63, %v5441_v31  ;;  %vm5446_vm6 = vmmov %vm5444_vm7  ;;  %vm5467_vm3 = vcmask 818176   ;;  %v5489_v63 = vld [vmem:[#allocation76_spill] sm:$0xff] }
 0x439   : > { %v2548_v51 = vsel %vm5446_vm6, %v2547_v11, %v5445_v36  ;;  %vm5449_vm0 = vmmov %vm5446_vm6  ;;  %vm5471_vm6 = vcmask 850944   ;;  %v5487_v11 = vld [vmem:[#allocation43_spill] sm:$0xff] }
 0x43a   : > { %v2549_v0 = vsel %vm5448_vm11, %v2548_v51, %v5447_v18  ;;  %vm5451_vm4 = vmmov %vm5435_vm1  ;;  %v5495_v18 = vld [vmem:[#allocation118_spill] sm:$0xff] }
 0x43b   : > { %v2385_v37 = vpop.permute.xlu1 %2384  ;;  %v2474_v28 = vsel %vm5451_vm4, %v2472_v23, %v5450_v13  ;;  %vm5453_vm5 = vmmov %vm5448_vm11  ;;  %v2550_v43 = vsel %vm2479_vm13, %v2549_v0, %v5458_v47  ;;  %v5492_v23 = vld [vmem:[#allocation83_spill] sm:$0xff] }
 0x43c   : > { %v2701_v39 = vsel %vm5433_vm9, %v2700_v15, %v2385_v37  ;;  %v2518_v45 = vsel %vm5453_vm5, %v2517_v33, %v5452_v54  ;;  %vm5454_vm9 = vmmov %vm5453_vm5  ;;  %v2551_v3 = vsel %vm5460_vm10, %v2550_v43, %v5459_v59  ;;  %v5493_v33 = vld [vmem:[#allocation110_spill] sm:$0xff]  ;;  %v5503_v43 = vld [vmem:[#allocation112_spill] sm:$0xff] }
 0x43d   : > { %v2702_v61 = vsel %vm5440_vm8, %v2701_v39, %v2389_v40  ;;  %vm5456_vm1 = vmmov %vm5449_vm0  ;;  %v2519_v2 = vsel %vm2479_vm13, %v2518_v45, %v5457_v29  ;;  %v5463_v40 = vld [vmem:[#allocation72_spill] sm:$0xff]  ;;  %v5499_v45 = vld [vmem:[#allocation78_spill] sm:$0xff] }
 0x43e   : > { %v2703_v7 = vsel %vm5449_vm0, %v2702_v61, %v2393_v32  ;;  %v2476_v38 = vsel %vm5456_vm1, %v2474_v28, %v5455_v35  ;;  %vm5462_vm2 = vmmov %vm5453_vm5  ;;  %v2413_v32 = vpop.permute.xlu2 %2412  ;;  %v2417_v39 = vpop.permute.xlu0 %2416  ;;  %v5498_v28 = vld [vmem:[#allocation45_spill] sm:$0xff] }
 0x43f   : > { %v2478_v1 = vsel %vm5462_vm2, %v2476_v38, %v5461_v10  ;;  %vm5464_vm8 = vmmov %vm5460_vm10  ;;  %v5500_v38 = vld [vmem:[#allocation52_spill] sm:$0xff] }
 0x440   : > { %v2520_v24 = vsel %vm5464_vm8, %v2519_v2, %v5463_v40  ;;  %v2480_v48 = vsel %vm2479_vm13, %v2478_v1, %v5465_v55  ;;  %vm5469_vm7 = vmmov %vm5467_vm3  ;;  %v5501_v2 = vld [vmem:[#allocation85_spill] sm:$0xff]  ;;  %v5509_v1 = vld [vmem:[#allocation47_spill] sm:$0xff] }
 0x441   : > { %v2521_v37 = vsel %vm5467_vm3, %v2520_v24, %v5466_v46  ;;  %v2552_v6 = vsel %vm5469_vm7, %v2551_v3, %v5468_v41  ;;  %vm5472_vm11 = vmmov %vm5464_vm8  ;;  %vm5497_vm7 = vcmask 1014784  }
 0x442   : > { %v2553_v50 = vsel %vm5471_vm6, %v2552_v6, %v5470_v57  ;;  %vm5473_vm0 = vmmov %vm5467_vm3 }
 0x443   : > { %v2397_v56 = vpop.permute.xlu1 %2396  ;;  %vm5475_vm4 = vmmov %vm5464_vm8 }
 0x444   : > { %v2704_v52 = vsel %vm5454_vm9, %v2703_v7, %v2397_v56  ;;  %v2482_v25 = vsel %vm5475_vm4, %v2480_v48, %v5474_v27  ;;  %vm5477_vm5 = vmmov %vm5471_vm6  ;;  %vm5481_vm9 = vcmask 883712   ;;  %v5490_v56 = vld [vmem:[#allocation50_spill] sm:$0xff]  ;;  %v5496_v7 = vld [vmem:[#allocation119_spill] sm:$0xff]  ;;  %vm2737_vm4 = vcmask 1046534  }
 0x445   : > { %v2705_v12 = vsel %vm2479_vm13, %v2704_v52, %v2401_v42  ;;  %v2522_v5 = vsel %vm5477_vm5, %v2521_v37, %v5476_v60  ;;  %vm5479_vm13 = vmmov %vm5473_vm0  ;;  %v2589_v13 = vsel %vm5497_vm7, %v4394_v14, %v5496_v7 }
 0x446   : > { %v2706_v53 = vsel %vm5472_vm11, %v2705_v12, %v2405_v26  ;;  %v2484_v15 = vsel %vm5479_vm13, %v2482_v25, %v5478_v30  ;;  %v2523_v17 = vsel %vm5481_vm9, %v2522_v5, %v5480_v22  ;;  %vm5483_vm1 = vmmov %vm5481_vm9  ;;  %v2425_v35 = vpop.permute.xlu2 %2424  ;;  %v2724_v14 = vrot.slane %v2589_v13, 5  ;;  %v2429_v12 = vpop.permute.xlu0 %2428 }
 0x447   : > { %v2554_v20 = vsel %vm5483_vm1, %v2553_v50, %v5482_v9  ;;  %vm5486_vm10 = vmmov %vm5477_vm5  ;;  %v2524_v42 = vsel %vm2489_vm12, %v2523_v17, %v5489_v63  ;;  %vm2733_vm13 = vcmask 1041408   ;;  %vm2739_vm9 = vcmask 1045508  }
 0x448   : > { %v2555_v8 = vsel %vm2489_vm12, %v2554_v20, %v5484_v4  ;;  %vm5488_vm2 = vmmov %vm5477_vm5  ;;  %v2525_v19 = vsel %vm2491_vm15, %v2524_v42, %v5492_v23 }
 0x449   : > { %v2486_v34 = vsel %vm5488_vm2, %v2484_v15, %v5487_v11  ;;  %vm5491_vm8 = vmmov %vm5483_vm1  ;;  %v2556_v36 = vsel %vm2491_vm15, %v2555_v8, %v5493_v33  ;;  %v2526_v52 = vsel %vm2493_vm14, %v2525_v19, %v5499_v45 }
 0x44a   : > { %v2488_v31 = vsel %vm5491_vm8, %v2486_v34, %v5490_v56  ;;  %vm5494_vm3 = vmmov %vm5483_vm1  ;;  %v2557_v0 = vsel %vm2493_vm14, %v2556_v36, %v5495_v18 }
 0x44b   : > { %v2409_v21 = vpop.permute.xlu1 %2408  ;;  %v2490_v54 = vsel %vm2489_vm12, %v2488_v31, %v5498_v28  ;;  %vm5502_vm6 = vmmov %vm5497_vm7 }
 0x44c   : > { %v2707_v58 = vsel %vm5473_vm0, %v2706_v53, %v2409_v21  ;;  %v2492_v29 = vsel %vm2491_vm15, %v2490_v54, %v5500_v38  ;;  %v2527_v47 = vsel %vm5502_vm6, %v2526_v52, %v5501_v2  ;;  %vm5504_vm11 = vmmov %vm5502_vm6  ;;  %vm2731_vm0 = vcmask 1042434  }
 0x44d   : > { %v2708_v62 = vsel %vm5486_vm10, %v2707_v58, %v2413_v32  ;;  %v2558_v59 = vsel %vm5504_vm11, %v2557_v0, %v5503_v43  ;;  %v2494_v40 = vsel %vm2493_vm14, %v2492_v29, %v5509_v1  ;;  %v2722_v24 = vrot.slane %v2527_v47, 7  ;;  %vm5510_vm5 = vmmov %vm5502_vm6 }
 0x44e   : > { %v2709_v51 = vsel %vm5494_vm3, %v2708_v62, %v2417_v39  ;;  %v2723_v21 = vrot.slane %v2558_v59, 6  ;;  %vm5513_vm1 = vmmov %vm5510_vm5  ;;  %vm2741_vm10 = vcmask 1043456  }
 0x450   : > { %v2732_v37 = vsel %vm2731_vm0, %v2723_v21, %v2724_v14 }
 0x453   : > { %v2421_v61 = vpop.permute.xlu1 %2420 }
 0x454   : > { %v2710_v26 = vsel %vm2489_vm12, %v2709_v51, %v2421_v61  ;;  %vm5505_vm12 = vmmov %vm5502_vm6 }
 0x455   : > { %v2711_v3 = vsel %vm2491_vm15, %v2710_v26, %v2425_v35  ;;  %v2682_v10 = vsel %vm5505_vm12, %v4737_v16, %v4729_v44  ;;  %vm2729_vm15 = vcmask 1040384   ;;  %v5512_v16 = vld [vmem:[#allocation55_spill] sm:$0xff] }
 0x456   : > { %v2712_v48 = vsel %vm2493_vm14, %v2711_v3, %v2429_v12  ;;  %v2727_v41 = vrot.slane %v2682_v10, 2  ;;  %v2496_v6 = vsel %vm5513_vm1, %v2494_v40, %v5512_v16 }
 0x457   : > { %v2730_v57 = vsel %vm2729_vm15, %v2496_v6, %v2722_v24 }
 0x458   : > { %v2734_v53 = vsel %vm2733_vm13, %v2730_v57, %v2732_v37 }
 0x45b   : > { %v2433_v55 = vpop.permute.xlu1 %2432 }
 0x45c   : > { %v2713_v46 = vsel %vm5510_vm5, %v2712_v48, %v2433_v55 }
 0x45d   : > { %v2728_v44 = vrot.slane %v2713_v46, 1 }
 0x45f   : > { %v2738_v50 = vsel %vm2737_vm4, %v2727_v41, %v2728_v44 }
 0x460   : > { %v2740_v32 = vsel %vm2739_vm9, %v4671_v49, %v2738_v50 }
 0x461   : > { %v2742_v58 = vsel %vm2741_vm10, %v2734_v53, %v2740_v32 }
 0x462   : > { %2744 = vst [vmem:[%s152_s19] sm:$0xff] %v2742_v58 }
 0x463   : > { %3014 = shalt.err (!%p3011_p13)
}
 0x464   : > { %2863 = dma.vmem_to_hbm [thread:$0]  (%p3165_p9), %s2761_s20, 128, %s2763_s21, %s2746_s4  }
 0x465 PF: > { %s5515_s24 = sld [smem:[#allocation8_spill]]  ;;  %p2870_p0 = pnand %p2849_p12, %p3172_p11 }
 0x466   : > { %s5517_s26 = sld [smem:[#allocation13_spill]] }
 0x467   : > { %p2871_p1 = pneg %p2870_p0 }
 0x46b   : > { %s2774_s27 = sand.u32 1, %s5515_s24  }
 0x46c   : > { %s2775_s28 = scalar_lea.sflag [#allocation4], %s2774_s27 }
 0x46d   : > { %3044 = dma.done.wait (%p2871_p1), %s2775_s28, 128  }
 0x46e   : > { %3046 = vsyncadd (%p2871_p1), %s2775_s28, 4294967168  ;;  %s17_s11 = sadd.s32 1, %s5517_s26   ;;  %s5518_s6 = sld [smem:[#allocation9_spill]] }
 0x46f   : > { %p14_p2 = scmp.ge.s32.totalorder %s17_s11, 4   ;;  %s5519_s7 = sld [smem:[#allocation10_spill]] }
 0x470   : > { %s5520_s8 = sld [smem:[#allocation16_spill]] }
 0x471   : > { %s5521_s9 = sld [smem:[#allocation12_spill]]  ;;  %16 = sbr.rel (!%p14_p2) target bundleno = 9 (0x9), region = 69 }
 0x472   : > { %s5522_s10 = sld [smem:[#allocation14_spill]] }
 0x476   :  { %2781 = vsyncpa [#allocation3], 1 }
 0x477   :  { %2783 = vsyncpa [#allocation3 + $0x1], 1 }
 0x478   :  { %2784 = vsyncpa [#allocation4], 1 }
 0x479   :  { %2786 = vsyncpa [#allocation4 + $0x1], 1 }

</bundles_post_ra>
